<compile_context>
chip_gen: v7x
topology: tpu7x:2x2x1
jax: 0.10.0
libtpu: 0.0.40
codegen_flags: <defaults>
</compile_context>

<pallas_src>
import functools
import math

import jax
import jax.numpy as jnp
from jax.experimental import pallas as pl
from jax.experimental.pallas import tpu as pltpu


def _round_up(a: int, b: int) -> int:
    return -(-a // b) * b


def _cdiv(a: int, b: int) -> int:
    return -(-a // b)


def _entity_attn_kernel(x_ref, wq_ref, wk_ref, wv_ref, wo_ref, sel_ref, out_ref, *,
                        num_entities: int, num_real_entities: int, own_idx: int,
                        scaling: float, param_dtype, approx_recip: bool):
    """One grid step: block_n agent rows, full (padded) E entities, full D.

    x_ref    : [block_n * E_pad, D]  NATIVE dtype (cast in-kernel)
    wq/k/v/o : [D, D]                param dtype (bf16 by default)
    sel_ref  : [D, D]                0/1 block-diagonal head selector, param dtype
    out_ref  : [block_n, D]
    """
    ne = num_entities
    D = wq_ref.shape[0]
    tn = out_ref.shape[0]

    # Cast the tile in-kernel; x travels HBM->VMEM in its native dtype so the
    # wrapper never runs a standalone convert pass over HBM.
    x = x_ref[...].astype(param_dtype)                        # [tn*ne, D]
    x_own = x.reshape(tn, ne, D)[:, own_idx, :]               # [tn, D]

    # Projections on the MXU with f32 accumulation. k/v over all entities,
    # q only for the own-entity rows (no wasted q flops). Separate matmuls keep
    # every operand/output lane-aligned for arbitrary D.
    k = jnp.dot(x, wk_ref[...], preferred_element_type=jnp.float32)      # [tn*ne, D]
    v = jnp.dot(x, wv_ref[...], preferred_element_type=jnp.float32)      # [tn*ne, D]
    q = jnp.dot(x_own, wq_ref[...], preferred_element_type=jnp.float32)  # [tn, D]
    q = q * scaling        # 1/sqrt(head_dim) in f32, keeps the selector exact 0/1
    k = k.reshape(tn, ne, D)
    v = v.reshape(tn, ne, D)

    # Per-head scores broadcast to each head's D lanes via one MXU matmul with
    # the 0/1 block-diagonal head selector (operands in param dtype):
    #   s[n, e, d] = sum_{d' in head(d)} (scale*q[n, d']) * k[n, e, d']
    qk = (q[:, None, :] * k).astype(sel_ref.dtype)            # [tn, ne, D]
    s = jnp.dot(qk.reshape(tn * ne, D), sel_ref[...],
                preferred_element_type=jnp.float32).reshape(tn, ne, D)

    # Mask entity-axis padding (only generated when E % 8 != 0).
    if num_real_entities != ne:
        ent = jax.lax.broadcasted_iota(jnp.int32, (ne, D), 0)
        bias = jnp.where(ent < num_real_entities, 0.0, -1e30).astype(jnp.float32)
        s = s + bias[None, :, :]

    # Softmax over entities (E = sublane axis), full D lane width, f32 math.
    m = jnp.max(s, axis=1, keepdims=True)                     # [tn, 1, D]
    p = jnp.exp(s - m)                                        # EUP
    denom = jnp.sum(p, axis=1, keepdims=True)
    p = p * pl.reciprocal(denom, approx=approx_recip)         # EUP slot if approx
    ctx = jnp.sum(p * v, axis=1)                              # [tn, D] f32

    # Output projection (MXU), operands in param dtype, f32 accumulation.
    out = jnp.dot(ctx.astype(wo_ref.dtype), wo_ref[...],
                  preferred_element_type=jnp.float32)
    out_ref[...] = out.astype(out_ref.dtype)


def entity_attn_pallas(x, wq, wk, wv, wo, *, num_heads, own_idx=0,
                       block_n=None, param_dtype=jnp.bfloat16,
                       approx_recip=True):
    """x: [N, E, D] -> [N, D]."""
    N, E, D = x.shape
    if D % num_heads != 0:
        raise ValueError(
            f"embed_dim ({D}) must be divisible by num_heads ({num_heads}).")
    if not (0 <= own_idx < E):
        raise ValueError(f"own_idx {own_idx} out of range for {E} entities.")
    head_dim = D // num_heads
    scaling = head_dim ** -0.5
    out_dtype = x.dtype
    x_itemsize = jnp.dtype(x.dtype).itemsize
    p_itemsize = jnp.dtype(param_dtype).itemsize

    # Pad the entity axis to a sublane multiple; padded entities are masked to
    # -1e30 scores in-kernel.
    E_pad = _round_up(E, 8)

    # Tile sizing: target ~2 MiB of input per block so DMA stays overlapped
    # without blowing up the ~8x f32 intermediates at large D.
    if block_n is None:
        block_n = (2 * 1024 * 1024) // (E_pad * D * x_itemsize)
    block_n = max(8, min(block_n, 4096, _round_up(N, 8)))
    block_n = _round_up(block_n, 8)
    # v7x megacore: keep >= 8 grid steps (>= 4 per TensorCore) when N allows it.
    while block_n >= 256 and _cdiv(N, block_n) < 8:
        block_n = _round_up(block_n // 2, 8)
    Np = _round_up(N, block_n)

    pad_n, pad_e = Np - N, E_pad - E
    x_p = jnp.pad(x, ((0, pad_n), (0, pad_e), (0, 0))) if (pad_n or pad_e) else x
    # Free reshape to a lane-dense 2-D slab; NO dtype cast here (done in-kernel).
    x_flat = x_p.reshape(Np * E_pad, D)

    wq_c = wq.astype(param_dtype)
    wk_c = wk.astype(param_dtype)
    wv_c = wv.astype(param_dtype)
    wo_c = wo.astype(param_dtype)
    # Exact 0/1 block-diagonal head selector (scale applied to q in-kernel).
    hid = jnp.arange(D, dtype=jnp.int32) // head_dim
    sel = (hid[:, None] == hid[None, :]).astype(param_dtype)

    grid = (Np // block_n,)
    kernel = functools.partial(
        _entity_attn_kernel, num_entities=E_pad, num_real_entities=E,
        own_idx=own_idx, scaling=scaling, param_dtype=param_dtype,
        approx_recip=approx_recip)

    # Advisory cost estimate.
    flops = 2 * D * D * (3 * Np * E_pad + 2 * Np)     # k, v, selector; q, out proj
    transcendentals = Np * E_pad * D                  # exp on head-broadcast scores
    bytes_accessed = (x_flat.size * x_itemsize + 5 * D * D * p_itemsize
                      + Np * D * jnp.dtype(out_dtype).itemsize)

    # VMEM budget: double-buffered in/out tiles + weights + generous f32
    # temporaries; floored at the 32 MiB default scoped limit, capped at 80% of
    # the chip's physical VMEM (v7x: 64 MiB -> ~51 MiB; v5e/v6e: 128 -> ~102).
    in_tile = block_n * E_pad * D * x_itemsize
    out_tile = block_n * D * jnp.dtype(out_dtype).itemsize
    w_bytes = 5 * D * D * p_itemsize
    interm = block_n * E_pad * D * 4 * 8
    need = 2 * in_tile + 2 * out_tile + 2 * w_bytes + interm
    try:
        vmem_cap = int(getattr(pltpu.get_tpu_info(), "vmem_capacity_bytes",
                               64 * 1024 * 1024))
    except Exception:
        vmem_cap = 64 * 1024 * 1024   # conservative fallback
    vmem_limit = int(min(max(need, 32 * 1024 * 1024), (vmem_cap * 4) // 5))

    out = pl.pallas_call(
        kernel,
        out_shape=jax.ShapeDtypeStruct((Np, D), out_dtype),
        grid_spec=pltpu.PrefetchScalarGridSpec(
            num_scalar_prefetch=0,
            grid=grid,
            in_specs=[
                pl.BlockSpec((block_n * E_pad, D), lambda i: (i, 0)),  # x (native)
                pl.BlockSpec((D, D), lambda i: (0, 0)),                # wq
                pl.BlockSpec((D, D), lambda i: (0, 0)),                # wk
                pl.BlockSpec((D, D), lambda i: (0, 0)),                # wv
                pl.BlockSpec((D, D), lambda i: (0, 0)),                # wo
                pl.BlockSpec((D, D), lambda i: (0, 0)),                # selector
            ],
            out_specs=pl.BlockSpec((block_n, D), lambda i: (i, 0)),
        ),
        compiler_params=pltpu.CompilerParams(
            dimension_semantics=("parallel",),
            vmem_limit_bytes=vmem_limit),
        cost_estimate=pl.CostEstimate(flops=int(flops),
                                      transcendentals=int(transcendentals),
                                      bytes_accessed=int(bytes_accessed)),
    )(x_flat, wq_c, wk_c, wv_c, wo_c, sel)
    return out[:N]


def entity_attn_layer(entities, wq, wk, wv, wo, *, num_heads, own_idx=0,
                      keep_dim=False, block_n=None, param_dtype=jnp.bfloat16,
                      approx_recip=True):
    """entities: [B, T, A, E, D] -> [B, T, A, D] (or [B, T, A, 1, D] if keep_dim)."""
    B, T, A, E, D = entities.shape
    x = entities.reshape(B * T * A, E, D)
    out = entity_attn_pallas(x, wq, wk, wv, wo, num_heads=num_heads,
                             own_idx=own_idx, block_n=block_n,
                             param_dtype=param_dtype, approx_recip=approx_recip)
    out = out.reshape(B, T, A, D)
    if keep_dim:
        out = out.reshape(B, T, A, 1, D)
    return out


def entity_attn_reference(entities, wq, wk, wv, wo, *, num_heads, own_idx=0):
    """Pure-JAX f32 reference matching the PyTorch module."""
    B, T, A, E, D = entities.shape
    hd = D // num_heads
    x = entities.reshape(B * T * A, E, D)
    q = x[:, own_idx, :] @ wq
    k = jnp.einsum('ned,df->nef', x, wk)
    v = jnp.einsum('ned,df->nef', x, wv)
    qh = q.reshape(-1, num_heads, hd)
    kh = k.reshape(-1, E, num_heads, hd)
    vh = v.reshape(-1, E, num_heads, hd)
    s = jnp.einsum('nhd,nehd->nhe', qh, kh) / math.sqrt(hd)
    p = jax.nn.softmax(s, axis=-1)
    o = jnp.einsum('nhe,nehd->nhd', p, vh).reshape(-1, D)
    return (o @ wo).reshape(B, T, A, D)


if __name__ == "__main__":
    key = jax.random.PRNGKey(0)
    k_ent, k_q, k_k, k_v, k_o, k_ent2 = jax.random.split(key, 6)

    # Config 1: E multiple of 8, own_idx = 0.
    B, T, A, E = 2, 3, 5, 8
    embed_dim, num_heads = 32, 4          # head_dim = 8
    init_scale = 1.0 / math.sqrt(embed_dim)
    entities = jax.random.normal(k_ent, (B, T, A, E, embed_dim), dtype=jnp.float32)
    wq = jax.random.uniform(k_q, (embed_dim, embed_dim), jnp.float32,
                            -init_scale, init_scale)
    wk = jax.random.uniform(k_k, (embed_dim, embed_dim), jnp.float32,
                            -init_scale, init_scale)
    wv = jax.random.uniform(k_v, (embed_dim, embed_dim), jnp.float32,
                            -init_scale, init_scale)
    wo = jax.random.uniform(k_o, (embed_dim, embed_dim), jnp.float32,
                            -init_scale, init_scale)

    ref = entity_attn_reference(entities, wq, wk, wv, wo,
                                num_heads=num_heads, own_idx=0)

    # 1) f32 operands + exact reciprocal: tight numerical check.
    out_f32 = entity_attn_layer(entities, wq, wk, wv, wo, num_heads=num_heads,
                                own_idx=0, keep_dim=False,
                                param_dtype=jnp.float32, approx_recip=False)
    out_f32 = jax.block_until_ready(out_f32)
    assert out_f32.shape == (B, T, A, embed_dim), out_f32.shape
    assert jnp.allclose(out_f32, ref, atol=1e-4, rtol=1e-4), \
        float(jnp.max(jnp.abs(out_f32 - ref)))

    # 2) Production config: bf16 MXU operands (cast in-kernel) + approx recip.
    out_bf16 = entity_attn_layer(entities, wq, wk, wv, wo, num_heads=num_heads,
                                 own_idx=0, keep_dim=False)
    out_bf16 = jax.block_until_ready(out_bf16)
    assert out_bf16.shape == (B, T, A, embed_dim), out_bf16.shape
    assert jnp.allclose(out_bf16, ref, atol=5e-2, rtol=5e-2), \
        float(jnp.max(jnp.abs(out_bf16 - ref)))

    # 3) Ragged config: E=5 (entity-axis pad + mask), own_idx=2, keep_dim=True.
    B2, T2, A2, E2 = 1, 2, 3, 5
    entities2 = jax.random.normal(k_ent2, (B2, T2, A2, E2, embed_dim),
                                  dtype=jnp.float32)
    ref2 = entity_attn_reference(entities2, wq, wk, wv, wo,
                                 num_heads=num_heads, own_idx=2)
    out2 = entity_attn_layer(entities2, wq, wk, wv, wo, num_heads=num_heads,
                             own_idx=2, keep_dim=True,
                             param_dtype=jnp.float32, approx_recip=False)
    out2 = jax.block_until_ready(out2)
    assert out2.shape == (B2, T2, A2, 1, embed_dim), out2.shape
    assert jnp.allclose(out2.reshape(B2, T2, A2, embed_dim), ref2,
                        atol=1e-4, rtol=1e-4), \
        float(jnp.max(jnp.abs(out2.reshape(B2, T2, A2, embed_dim) - ref2)))

    print("KERNEL_OK")
</pallas_src>

<mosaic_0001>
module attributes {stable_mosaic.version = 11 : i64} {
  func.func @_entity_attn_kernel(%arg0: i32, %arg1: memref<256x32xf32, #tpu.memory_space<vmem>>, %arg2: memref<32x32xf32, #tpu.memory_space<vmem>>, %arg3: memref<32x32xf32, #tpu.memory_space<vmem>>, %arg4: memref<32x32xf32, #tpu.memory_space<vmem>>, %arg5: memref<32x32xf32, #tpu.memory_space<vmem>>, %arg6: memref<32x32xf32, #tpu.memory_space<vmem>>, %arg7: memref<32x32xf32, #tpu.memory_space<vmem>>) attributes {dimension_semantics = [#tpu.dimension_semantics<parallel>], iteration_bounds = array<i64: 1>, scalar_prefetch = 0 : i64, scratch_operands = 0 : i64, tpu.core_type = #tpu.core_type<tc>, window_params = [{transform_indices = @transform_0, window_bounds = array<i64: 256, 32>}, {pipeline_mode = #tpu.pipeline_mode<synchronous>, transform_indices = @transform_1, window_bounds = array<i64: 32, 32>}, {pipeline_mode = #tpu.pipeline_mode<synchronous>, transform_indices = @transform_2, window_bounds = array<i64: 32, 32>}, {pipeline_mode = #tpu.pipeline_mode<synchronous>, transform_indices = @transform_3, window_bounds = array<i64: 32, 32>}, {pipeline_mode = #tpu.pipeline_mode<synchronous>, transform_indices = @transform_4, window_bounds = array<i64: 32, 32>}, {pipeline_mode = #tpu.pipeline_mode<synchronous>, transform_indices = @transform_5, window_bounds = array<i64: 32, 32>}, {transform_indices = @transform_6, window_bounds = array<i64: 32, 32>}]} {
    %c0 = arith.constant 0 : index
    %c0_0 = arith.constant 0 : index
    %0 = vector.load %arg1[%c0, %c0_0] : memref<256x32xf32, #tpu.memory_space<vmem>>, vector<256x32xf32>
    %1 = vector.shape_cast %0 : vector<256x32xf32> to vector<32x8x32xf32>
    %2 = vector.extract_strided_slice %1 {offsets = [0, 0, 0], sizes = [32, 1, 32], strides = [1, 1, 1]} : vector<32x8x32xf32> to vector<32x1x32xf32>
    %3 = vector.shape_cast %2 : vector<32x1x32xf32> to vector<32x32xf32>
    %c0_1 = arith.constant 0 : index
    %c0_2 = arith.constant 0 : index
    %4 = vector.load %arg3[%c0_1, %c0_2] : memref<32x32xf32, #tpu.memory_space<vmem>>, vector<32x32xf32>
    %cst = arith.constant dense<0.000000e+00> : vector<256x32xf32>
    %5 = tpu.matmul %0, %4, %cst {dimension_numbers = #tpu.dot_dimension_numbers<[1], [0], [0], [1], [0, 0, 1, 1], [], []>} : vector<256x32xf32>, vector<32x32xf32>, vector<256x32xf32> -> vector<256x32xf32>
    %c0_3 = arith.constant 0 : index
    %c0_4 = arith.constant 0 : index
    %6 = vector.load %arg4[%c0_3, %c0_4] : memref<32x32xf32, #tpu.memory_space<vmem>>, vector<32x32xf32>
    %cst_5 = arith.constant dense<0.000000e+00> : vector<256x32xf32>
    %7 = tpu.matmul %0, %6, %cst_5 {dimension_numbers = #tpu.dot_dimension_numbers<[1], [0], [0], [1], [0, 0, 1, 1], [], []>} : vector<256x32xf32>, vector<32x32xf32>, vector<256x32xf32> -> vector<256x32xf32>
    %c0_6 = arith.constant 0 : index
    %c0_7 = arith.constant 0 : index
    %8 = vector.load %arg2[%c0_6, %c0_7] : memref<32x32xf32, #tpu.memory_space<vmem>>, vector<32x32xf32>
    %cst_8 = arith.constant dense<0.000000e+00> : vector<32x32xf32>
    %9 = tpu.matmul %3, %8, %cst_8 {dimension_numbers = #tpu.dot_dimension_numbers<[1], [0], [0], [1], [0, 0, 1, 1], [], []>} : vector<32x32xf32>, vector<32x32xf32>, vector<32x32xf32> -> vector<32x32xf32>
    %cst_9 = arith.constant 0.353553385 : f32
    %10 = vector.broadcast %cst_9 : f32 to vector<32x32xf32>
    %11 = arith.mulf %9, %10 : vector<32x32xf32>
    %12 = vector.shape_cast %5 : vector<256x32xf32> to vector<32x8x32xf32>
    %13 = vector.shape_cast %7 : vector<256x32xf32> to vector<32x8x32xf32>
    %14 = vector.shape_cast %11 : vector<32x32xf32> to vector<32x1x32xf32>
    %15 = vector.broadcast %14 : vector<32x1x32xf32> to vector<32x8x32xf32>
    %16 = arith.mulf %15, %12 : vector<32x8x32xf32>
    %17 = vector.shape_cast %16 : vector<32x8x32xf32> to vector<256x32xf32>
    %c0_10 = arith.constant 0 : index
    %c0_11 = arith.constant 0 : index
    %18 = vector.load %arg6[%c0_10, %c0_11] : memref<32x32xf32, #tpu.memory_space<vmem>>, vector<32x32xf32>
    %cst_12 = arith.constant dense<0.000000e+00> : vector<256x32xf32>
    %19 = tpu.matmul %17, %18, %cst_12 {dimension_numbers = #tpu.dot_dimension_numbers<[1], [0], [0], [1], [0, 0, 1, 1], [], []>} : vector<256x32xf32>, vector<32x32xf32>, vector<256x32xf32> -> vector<256x32xf32>
    %20 = vector.shape_cast %19 : vector<256x32xf32> to vector<32x8x32xf32>
    %cst_13 = arith.constant dense<0xFF800000> : vector<32x32xf32>
    %21 = vector.multi_reduction <maximumf>, %20, %cst_13 [1] : vector<32x8x32xf32> to vector<32x32xf32>
    %22 = vector.shape_cast %21 : vector<32x32xf32> to vector<32x1x32xf32>
    %23 = vector.broadcast %22 : vector<32x1x32xf32> to vector<32x8x32xf32>
    %24 = arith.subf %20, %23 : vector<32x8x32xf32>
    %25 = math.exp %24 : vector<32x8x32xf32>
    %cst_14 = arith.constant dense<0.000000e+00> : vector<32x32xf32>
    %26 = vector.multi_reduction <add>, %25, %cst_14 [1] : vector<32x8x32xf32> to vector<32x32xf32>
    %27 = vector.shape_cast %26 : vector<32x32xf32> to vector<32x1x32xf32>
    %28 = tpu.reciprocal %27 : vector<32x1x32xf32> -> vector<32x1x32xf32>
    %29 = vector.broadcast %28 : vector<32x1x32xf32> to vector<32x8x32xf32>
    %30 = arith.mulf %25, %29 : vector<32x8x32xf32>
    %31 = arith.mulf %30, %13 : vector<32x8x32xf32>
    %cst_15 = arith.constant dense<0.000000e+00> : vector<32x32xf32>
    %32 = vector.multi_reduction <add>, %31, %cst_15 [1] : vector<32x8x32xf32> to vector<32x32xf32>
    %c0_16 = arith.constant 0 : index
    %c0_17 = arith.constant 0 : index
    %33 = vector.load %arg5[%c0_16, %c0_17] : memref<32x32xf32, #tpu.memory_space<vmem>>, vector<32x32xf32>
    %cst_18 = arith.constant dense<0.000000e+00> : vector<32x32xf32>
    %34 = tpu.matmul %32, %33, %cst_18 {dimension_numbers = #tpu.dot_dimension_numbers<[1], [0], [0], [1], [0, 0, 1, 1], [], []>} : vector<32x32xf32>, vector<32x32xf32>, vector<32x32xf32> -> vector<32x32xf32>
    %c0_19 = arith.constant 0 : index
    %c0_20 = arith.constant 0 : index
    %35 = vector.load %arg7[%c0_19, %c0_20] : memref<32x32xf32, #tpu.memory_space<vmem>>, vector<32x32xf32>
    tpu.vector_store %arg7[%c0_19, %c0_20], %34 {strides = array<i32>} : memref<32x32xf32, #tpu.memory_space<vmem>>, vector<32x32xf32>,
    return
  }
  func.func @transform_0(%arg0: i32) -> (i32, i32) {
    %c0_i32 = arith.constant 0 : i32
    %c0_i32_0 = arith.constant 0 : i32
    return %arg0, %c0_i32 : i32, i32
  }
  func.func @transform_1(%arg0: i32) -> (i32, i32) {
    %c0_i32 = arith.constant 0 : i32
    %c0_i32_0 = arith.constant 0 : i32
    %c0_i32_1 = arith.constant 0 : i32
    return %c0_i32, %c0_i32_0 : i32, i32
  }
  func.func @transform_2(%arg0: i32) -> (i32, i32) {
    %c0_i32 = arith.constant 0 : i32
    %c0_i32_0 = arith.constant 0 : i32
    %c0_i32_1 = arith.constant 0 : i32
    return %c0_i32, %c0_i32_0 : i32, i32
  }
  func.func @transform_3(%arg0: i32) -> (i32, i32) {
    %c0_i32 = arith.constant 0 : i32
    %c0_i32_0 = arith.constant 0 : i32
    %c0_i32_1 = arith.constant 0 : i32
    return %c0_i32, %c0_i32_0 : i32, i32
  }
  func.func @transform_4(%arg0: i32) -> (i32, i32) {
    %c0_i32 = arith.constant 0 : i32
    %c0_i32_0 = arith.constant 0 : i32
    %c0_i32_1 = arith.constant 0 : i32
    return %c0_i32, %c0_i32_0 : i32, i32
  }
  func.func @transform_5(%arg0: i32) -> (i32, i32) {
    %c0_i32 = arith.constant 0 : i32
    %c0_i32_0 = arith.constant 0 : i32
    %c0_i32_1 = arith.constant 0 : i32
    return %c0_i32, %c0_i32_0 : i32, i32
  }
  func.func @transform_6(%arg0: i32) -> (i32, i32) {
    %c0_i32 = arith.constant 0 : i32
    %c0_i32_0 = arith.constant 0 : i32
    return %arg0, %c0_i32 : i32, i32
  }
}

</mosaic_0001>

<bundles_post_ra>
// kernel: tpu_custom_call.1
= control target key start
LH: loop header
LB: loop body
LE: loop exit
PB: predicated region body
PF: predicated region fallthrough
CT: control target
= control target key end

     0   :  { %vm60_vm0 = vcmask 261120   ;;  %vm616_vm1 = vcmask 1041409   ;;  %vm619_vm2 = vcmask 1042434   ;;  %vm622_vm3 = vcmask 1043459   ;;  %s4461_s0 = inlined_call_operand.vmem [shape: f32[256,32], index: 0, kind: input, shape index: {}]   ;;  %s4462_s1 = inlined_call_operand.vmem [shape: f32[32,32], index: 1, kind: input, shape index: {}]   ;;  %s4463_s2 = inlined_call_operand.vmem [shape: f32[32,32], index: 2, kind: input, shape index: {}]   ;;  %s4464_s3 = inlined_call_operand.vmem [shape: f32[32,32], index: 3, kind: input, shape index: {}]   ;;  %s4465_s4 = inlined_call_operand.vmem [shape: f32[32,32], index: 4, kind: input, shape index: {}]   ;;  %s4466_s5 = inlined_call_operand.vmem [shape: f32[32,32], index: 5, kind: input, shape index: {}]   ;;  %s4467_s6 = inlined_call_operand.hbm [shape: f32[32,32], index: 6, kind: output, shape index: {}]  }
   0x1   :  { %v56_v0 = vld [vmem:[%s4463_s2] sm:$0xff]  ;;  %v57_v1 = vld [vmem:[%s4463_s2 + $0x8] sm:$0xff]  ;;  %v58_v2 = vld [vmem:[%s4463_s2 + $0x10] sm:$0xff]  ;;  %vm625_vm4 = vcmask 1044484   ;;  %vm628_vm5 = vcmask 1045509   ;;  %vm631_vm6 = vcmask 1046534  }
   0x2   :  { %v2957_v3 = vpack.c.bf16 %v57_v1, %v56_v0  ;;  %v59_v4 = vld [vmem:[%s4463_s2 + $0x18] sm:$0xff]  ;;  %v3211_v5 = vld [vmem:[%s4461_s0] sm:$0xff]  ;;  %v383_v8 = vld [vmem:[%s4464_s3 + $0x8] sm:$0xff]  ;;  %vm634_vm7 = vcmask 1047559  }
   0x3   :  { %v2961_v6 = vpack.c.bf16 %v59_v4, %v58_v2  ;;  %2769 = vmatprep.mubr.msk.f32.mxu0 %vm60_vm0, %v3211_v5  ;;  %v382_v7 = vld [vmem:[%s4464_s3] sm:$0xff]  ;;  %v3224_v10 = vld [vmem:[%s4461_s0 + $0x48] sm:$0xff]  ;;  %v3229_v11 = vld [vmem:[%s4461_s0 + $0x50] sm:$0xff] }
   0x4   :  { %2958 = vmatprep.subr.bf16.mxu0 %v2957_v3  ;;  %v2965_v9 = vpack.c.bf16 %v383_v8, %v382_v7  ;;  %v3234_v12 = vld [vmem:[%s4461_s0 + $0x58] sm:$0xff]  ;;  %v3239_v13 = vld [vmem:[%s4461_s0 + $0x8] sm:$0xff]  ;;  %v3244_v14 = vld [vmem:[%s4461_s0 + $0x40] sm:$0xff]  ;;  %v636_v15 = vrot.slane %v3224_v10, 7  ;;  %v638_v16 = vrot.slane %v3229_v11, 6 }
   0x5   :  { %2960 = vmatpush3.bf16.msra.mxu0 %v2957_v3  ;;  %v640_v17 = vrot.slane %v3234_v12, 5  ;;  %v3252_v18 = vld [vmem:[%s4461_s0 + $0x60] sm:$0xff]  ;;  %v3258_v20 = vld [vmem:[%s4461_s0 + $0x68] sm:$0xff]  ;;  %v3263_v21 = vld [vmem:[%s4461_s0 + $0x70] sm:$0xff] }
   0x6   :  { %2962 = vmatprep.subr.bf16.mxu0 %v2961_v6  ;;  %2997 = vmatprep.subr.bf16.mxu1 %v2965_v9  ;;  %v642_v19 = vrot.slane %v3252_v18, 4  ;;  %v3268_v22 = vld [vmem:[%s4461_s0 + $0x88] sm:$0xff]  ;;  %v637_v23 = vsel %vm616_vm1, %v636_v15, %v3244_v14  ;;  %v644_v24 = vrot.slane %v3258_v20, 3  ;;  %v384_v26 = vld [vmem:[%s4464_s3 + $0x10] sm:$0xff]  ;;  %v385_v27 = vld [vmem:[%s4464_s3 + $0x18] sm:$0xff]  ;;  %v646_v31 = vrot.slane %v3263_v21, 2 }
   0x7   :  { %2999 = vmatpush3.bf16.msra.mxu1 %v2965_v9  ;;  %2843 = vmatprep.mubr.msk.f32.mxu1 %vm60_vm0, %v3252_v18  ;;  %v650_v25 = vrot.slane %v3268_v22, 7  ;;  %v3285_v28 = vld [vmem:[%s4461_s0 + $0x90] sm:$0xff]  ;;  %v639_v30 = vsel %vm619_vm2, %v638_v16, %v637_v23  ;;  %v3297_v32 = vld [vmem:[%s4461_s0 + $0x80] sm:$0xff]  ;;  %v2969_v33 = vpack.c.bf16 %v385_v27, %v384_v26  ;;  %v3303_v35 = vld [vmem:[%s4461_s0 + $0x98] sm:$0xff] }
   0x8   :  { %v3290_v29 = vld [vmem:[%s4461_s0 + $0x10] sm:$0xff]  ;;  %v652_v34 = vrot.slane %v3285_v28, 6  ;;  %v641_v36 = vsel %vm622_vm3, %v640_v17, %v639_v30  ;;  %v654_v38 = vrot.slane %v3303_v35, 5  ;;  %v39_v40 = vld [vmem:[%s4461_s0 + $0x78] sm:$0xff]  ;;  %v3319_v42 = vld [vmem:[%s4461_s0 + $0xa0] sm:$0xff] }
   0x9   :  { %2964 = vmatpush3.bf16.msra.mxu0 %v2961_v6  ;;  %v651_v37 = vsel %vm616_vm1, %v650_v25, %v3297_v32  ;;  %v643_v39 = vsel %vm625_vm4, %v642_v19, %v641_v36  ;;  %2998 = vmatprep.subr.bf16.mxu1 %v2969_v33  ;;  %v3326_v43 = vld [vmem:[%s4461_s0 + $0x18] sm:$0xff]  ;;  %v648_v45 = vrot.slane %v39_v40, 1  ;;  %v656_v47 = vrot.slane %v3319_v42, 4  ;;  %v3334_v48 = vld [vmem:[%s4461_s0 + $0x20] sm:$0xff]  ;;  %v612_v51 = vld [vmem:[%s4462_s1 + $0x8] sm:$0xff] }
   0xa   :  { %2966 = vmatprep.subr.bf16.mxu0 %v2965_v9  ;;  %v653_v41 = vsel %vm619_vm2, %v652_v34, %v651_v37  ;;  %v645_v44 = vsel %vm628_vm5, %v644_v24, %v643_v39  ;;  %v611_v50 = vld [vmem:[%s4462_s1] sm:$0xff] }
   0xb   :  { %v655_v46 = vsel %vm622_vm3, %v654_v38, %v653_v41  ;;  %v647_v49 = vsel %vm631_vm6, %v646_v31, %v645_v44  ;;  %3000 = vmatpush3.bf16.msra.mxu1 %v2969_v33  ;;  %v3345_v52 = vpack.c.bf16 %v612_v51, %v611_v50 }
   0xc   :  { %2770 = vmatmul.mubr.msk.f32.vlgmr.msra.gmra.mrb[0].mxu0 %vm60_vm0, %v3239_v13 }
   0xd   :  { %2968 = vmatpush3.bf16.msra.mxu0 %v2965_v9  ;;  %2772 = vmatprep.mubr.msk.f32.mxu0 %vm60_vm0, %v3290_v29 }
   0xe   :  { %2970 = vmatprep.subr.bf16.mxu0 %v2969_v33 }
  0x10   :  { %2773 = vmatmul.mubr.msk.f32.gmra.mrb[2].mxu0 %vm60_vm0, %v3326_v43 }
  0x11   :  { %11 = vsyncpa [#allocation3], 0  ;;  %2775 = vmatprep.mubr.msk.f32.mxu0 %vm60_vm0, %v3334_v48  ;;  %v3352_v53 = vld [vmem:[%s4461_s0 + $0x28] sm:$0xff]  ;;  %2972 = vmatpush3.bf16.msra.mxu0 %v2969_v33  ;;  %v3355_v54 = vsel %vm634_vm7, %v648_v45, %v647_v49  ;;  %v3358_v55 = vsel %vm625_vm4, %v656_v47, %v655_v46  ;;  %v3363_v56 = vld [vmem:[%s4461_s0 + $0x30] sm:$0xff]  ;;  %v615_v8 = vrot.slane %v3239_v13, 7  ;;  %v618_v15 = vrot.slane %v3290_v29, 6 }
  0x12   :  { %2974 = vmatprep.subr.bf16.mxu0 %v3345_v52  ;;  %2844 = vmatmul.mubr.msk.f32.vlgmr.msra.gmra.mrb[0].mxu1 %vm60_vm0, %v3258_v20  ;;  %v3377_v57 = vld [vmem:[%s4461_s0 + $0x38] sm:$0xff]  ;;  %v3405_v58 = vld [vmem:[%s4461_s0 + $0xa8] sm:$0xff]  ;;  %v3410_v59 = vld [vmem:[%s4461_s0 + $0xb0] sm:$0xff]  ;;  %v621_v17 = vrot.slane %v3326_v43, 5  ;;  %v630_v26 = vrot.slane %v3363_v56, 2 }
  0x13   :  { %2846 = vmatprep.mubr.msk.f32.mxu1 %vm60_vm0, %v3263_v21  ;;  %v3423_v60 = vld [vmem:[%s4461_s0 + $0xb8] sm:$0xff]  ;;  %v48_v61 = vld [vmem:[%s4461_s0 + $0xc0] sm:$0xff]  ;;  %v49_v62 = vld [vmem:[%s4461_s0 + $0xc8] sm:$0xff]  ;;  %v617_v16 = vsel %vm616_vm1, %v615_v8, %v3211_v5  ;;  %v658_v27 = vrot.slane %v3405_v58, 3  ;;  %v633_v31 = vrot.slane %v3377_v57, 1 }
  0x14   :  { %2776 = vmatmul.mubr.msk.f32.gmra.mrb[4].mxu0 %vm60_vm0, %v3352_v53  ;;  %v50_v63 = vld [vmem:[%s4461_s0 + $0xd0] sm:$0xff]  ;;  %v51_v0 = vld [vmem:[%s4461_s0 + $0xd8] sm:$0xff]  ;;  %v3452_v1 = vld [vmem:[%s4461_s0 + $0xe0] sm:$0xff]  ;;  %v664_v19 = vrot.slane %v49_v62, 7 }
  0x15   :  { %2778 = vmatprep.mubr.msk.f32.mxu0 %vm60_vm0, %v3363_v56  ;;  %v3464_v2 = vld [vmem:[%s4461_s0 + $0xe8] sm:$0xff]  ;;  %v3469_v3 = vld [vmem:[%s4461_s0 + $0xf0] sm:$0xff]  ;;  %v3482_v4 = vld [vmem:[%s4461_s0 + $0xf8] sm:$0xff]  ;;  %v668_v23 = vrot.slane %v51_v0, 5 }
  0x16   :  { %2847 = vmatmul.mubr.msk.f32.gmra.mrb[2].mxu1 %vm60_vm0, %v39_v40  ;;  %v613_v6 = vld [vmem:[%s4462_s1 + $0x10] sm:$0xff]  ;;  %v614_v7 = vld [vmem:[%s4462_s1 + $0x18] sm:$0xff]  ;;  %v672_v33 = vrot.slane %v3464_v2, 3  ;;  %v674_v37 = vrot.slane %v3469_v3, 2 }
  0x17   :  { %2849 = vmatprep.mubr.msk.f32.mxu1 %vm60_vm0, %v3297_v32  ;;  %v2977_v9 = vpack.c.bf16 %v614_v7, %v613_v6  ;;  %v1169_v45 = vld [vmem:[%s4466_s5 + $0x10] sm:$0xff]  ;;  %v1170_v46 = vld [vmem:[%s4466_s5 + $0x18] sm:$0xff] }
  0x18   :  { %2779 = vmatmul.mubr.msk.f32.gmra.mrb[6].mxu0 %vm60_vm0, %v3377_v57  ;;  %v2985_v47 = vpack.c.bf16 %v1170_v46, %v1169_v45  ;;  %v783_v46 = vlaneseq }
  0x19   :  { %2781 = vmatprep.mubr.msk.f32.mxu0 %vm60_vm0, %v3244_v14 }
  0x1a   :  { %2850 = vmatmul.mubr.msk.f32.gmra.mrb[4].mxu1 %vm60_vm0, %v3268_v22 }
  0x1b   :  { %2852 = vmatprep.mubr.msk.f32.mxu1 %vm60_vm0, %v3285_v28 }
  0x1c   :  { %2782 = vmatmul.mubr.msk.f32.gmra.mrb[8].mxu0 %vm60_vm0, %v3224_v10 }
  0x1d   :  { %2784 = vmatprep.mubr.msk.f32.mxu0 %vm60_vm0, %v3229_v11 }
  0x1e   :  { %2853 = vmatmul.mubr.msk.f32.gmra.mrb[6].mxu1 %vm60_vm0, %v3303_v35 }
  0x1f   :  { %2855 = vmatprep.mubr.msk.f32.mxu1 %vm60_vm0, %v3319_v42 }
  0x20   :  { %2785 = vmatmul.mubr.msk.f32.gmra.mrb[10].mxu0 %vm60_vm0, %v3234_v12 }
  0x21   :  { %2787 = vmatprep.mubr.msk.f32.mxu0 %vm60_vm0, %v3252_v18  ;;  %v620_v18 = vsel %vm619_vm2, %v618_v15, %v617_v16 }
  0x22   :  { %2856 = vmatmul.mubr.msk.f32.gmra.mrb[8].mxu1 %vm60_vm0, %v3405_v58 }
  0x23   :  { %2858 = vmatprep.mubr.msk.f32.mxu1 %vm60_vm0, %v3410_v59 }
  0x24   :  { %2788 = vmatmul.mubr.msk.f32.gmra.mrb[12].mxu0 %vm60_vm0, %v3258_v20  ;;  %v624_v20 = vrot.slane %v3334_v48, 4 }
  0x25   :  { %2790 = vmatprep.mubr.msk.f32.mxu0 %vm60_vm0, %v3263_v21  ;;  %v665_v21 = vsel %vm616_vm1, %v664_v19, %v48_v61 }
  0x26   :  { %2859 = vmatmul.mubr.msk.f32.gmra.mrb[10].mxu1 %vm60_vm0, %v3423_v60 }
  0x27   :  { %2861 = vmatprep.mubr.msk.f32.mxu1 %vm60_vm0, %v48_v61 }
  0x28   :  { %2791 = vmatmul.mubr.msk.f32.gmra.mrb[14].mxu0 %vm60_vm0, %v39_v40 }
  0x29   :  { %2793 = vmatprep.mubr.msk.f32.mxu0 %vm60_vm0, %v3297_v32  ;;  %v660_v32 = vrot.slane %v3410_v59, 2 }
  0x2a   :  { %2862 = vmatmul.mubr.msk.f32.gmra.mrb[12].mxu1 %vm60_vm0, %v49_v62 }
  0x2b   :  { %2864 = vmatprep.mubr.msk.f32.mxu1 %vm60_vm0, %v50_v63 }
  0x2c   :  { %2794 = vmatmul.mubr.msk.f32.gmra.mrb[16].mxu0 %vm60_vm0, %v3268_v22  ;;  %v627_v22 = vrot.slane %v3352_v53, 3 }
  0x2d   :  { %2796 = vmatprep.mubr.msk.f32.mxu0 %vm60_vm0, %v3285_v28  ;;  %v670_v28 = vrot.slane %v3452_v1, 4 }
  0x2e   :  { %2865 = vmatmul.mubr.msk.f32.gmra.mrb[14].mxu1 %vm60_vm0, %v51_v0 }
  0x2f   :  { %2867 = vmatprep.mubr.msk.f32.mxu1 %vm60_vm0, %v3452_v1 }
  0x30   :  { %2797 = vmatmul.mubr.msk.f32.gmra.mrb[18].mxu0 %vm60_vm0, %v3303_v35  ;;  %v659_v35 = vsel %vm628_vm5, %v658_v27, %v3358_v55 }
  0x31   :  { %2799 = vmatprep.mubr.msk.f32.mxu0 %vm60_vm0, %v3319_v42  ;;  %v661_v39 = vsel %vm631_vm6, %v660_v32, %v659_v35 }
  0x32   :  { %2868 = vmatmul.mubr.msk.f32.gmra.mrb[16].mxu1 %vm60_vm0, %v3464_v2 }
  0x33   :  { %2870 = vmatprep.mubr.msk.f32.mxu1 %vm60_vm0, %v3469_v3 }
  0x34   :  { %2800 = vmatmul.mubr.msk.f32.gmra.mrb[20].mxu0 %vm60_vm0, %v3405_v58 }
  0x35   :  { %2802 = vmatprep.mubr.msk.f32.mxu0 %vm60_vm0, %v3410_v59 }
  0x36   :  { %2871 = vmatmul.mubr.msk.f32.gmra.mrb[18].mxu1 %vm60_vm0, %v3482_v4 }
  0x38   :  { %2803 = vmatmul.mubr.msk.f32.gmra.mrb[22].mxu0 %vm60_vm0, %v3423_v60 }
  0x39   :  { %2805 = vmatprep.mubr.msk.f32.mxu0 %vm60_vm0, %v48_v61 }
  0x3c   :  { %2806 = vmatmul.mubr.msk.f32.gmra.mrb[24].mxu0 %vm60_vm0, %v49_v62 }
  0x3d   :  { %2808 = vmatprep.mubr.msk.f32.mxu0 %vm60_vm0, %v50_v63 }
  0x40   :  { %2809 = vmatmul.mubr.msk.f32.gmra.mrb[26].mxu0 %vm60_vm0, %v51_v0 }
  0x41   :  { %2811 = vmatprep.mubr.msk.f32.mxu0 %vm60_vm0, %v3452_v1 }
  0x44   :  { %2812 = vmatmul.mubr.msk.f32.gmra.mrb[28].mxu0 %vm60_vm0, %v3464_v2 }
  0x45   :  { %2814 = vmatprep.mubr.msk.f32.mxu0 %vm60_vm0, %v3469_v3 }
  0x48   :  { %2815 = vmatmul.mubr.msk.f32.gmra.mrb[30].mxu0 %vm60_vm0, %v3482_v4 }
  0x49   :  { %2825 = vmatprep.mubr.msk.f32.mxu0 %vm60_vm0, %v3211_v5  ;;  %v623_v5 = vsel %vm622_vm3, %v621_v17, %v620_v18 }
  0x4a   :  { %v626_v24 = vsel %vm625_vm4, %v624_v20, %v623_v5 }
  0x4c   :  { %2826 = vmatmul.mubr.msk.f32.vlgmr.msra.gmra.mrb[32].mxu0 %vm60_vm0, %v3239_v13  ;;  %v666_v13 = vrot.slane %v50_v63, 6 }
  0x4d   :  { %2976 = vmatpush3.bf16.msra.mxu0 %v3345_v52  ;;  %2828 = vmatprep.mubr.msk.f32.mxu0 %vm60_vm0, %v3290_v29  ;;  %v629_v29 = vsel %vm628_vm5, %v627_v22, %v626_v24 }
  0x4e   :  { %2978 = vmatprep.subr.bf16.mxu0 %v2977_v9  ;;  %v667_v25 = vsel %vm619_vm2, %v666_v13, %v665_v21  ;;  %v632_v34 = vsel %vm631_vm6, %v630_v26, %v629_v29 }
  0x4f   :  { %v669_v30 = vsel %vm622_vm3, %v668_v23, %v667_v25  ;;  %v635_v38 = vsel %vm634_vm7, %v633_v31, %v632_v34 }
  0x50   :  { %2829 = vmatmul.mubr.msk.f32.gmra.mrb[34].mxu0 %vm60_vm0, %v3326_v43  ;;  %v671_v36 = vsel %vm625_vm4, %v670_v28, %v669_v30  ;;  %v1168_v43 = vld [vmem:[%s4466_s5 + $0x8] sm:$0xff] }
  0x51   :  { %2831 = vmatprep.mubr.msk.f32.mxu0 %vm60_vm0, %v3334_v48  ;;  %2980 = vmatpush3.bf16.msra.mxu0 %v2977_v9  ;;  %v673_v40 = vsel %vm628_vm5, %v672_v33, %v671_v36 }
  0x54   :  { %2832 = vmatmul.mubr.msk.f32.gmra.mrb[36].mxu0 %vm60_vm0, %v3352_v53 }
  0x55   :  { %2834 = vmatprep.mubr.msk.f32.mxu0 %vm60_vm0, %v3363_v56 }
  0x58   :  { %2835 = vmatmul.mubr.msk.f32.gmra.mrb[38].mxu0 %vm60_vm0, %v3377_v57 }
  0x59   :  { %2837 = vmatprep.mubr.msk.f32.mxu0 %vm60_vm0, %v3244_v14  ;;  %v662_v14 = vrot.slane %v3423_v60, 1 }
  0x5b   :  { %v663_v41 = vsel %vm634_vm7, %v662_v14, %v661_v39 }
  0x5c   :  { %2838 = vmatmul.mubr.msk.f32.gmra.mrb[40].mxu0 %vm60_vm0, %v3224_v10  ;;  %v676_v10 = vrot.slane %v3482_v4, 1 }
  0x5d   :  { %2840 = vmatprep.mubr.msk.f32.mxu0 %vm60_vm0, %v3229_v11  ;;  %v675_v11 = vsel %vm631_vm6, %v674_v37, %v673_v40 }
  0x5e   :  { %v677_v42 = vsel %vm634_vm7, %v676_v10, %v675_v11 }
  0x60   :  { %2841 = vmatmul.mubr.msk.f32.gmra.mrb[42].mxu0 %vm60_vm0, %v3234_v12  ;;  %v1167_v12 = vld [vmem:[%s4466_s5] sm:$0xff] }
  0x61   :  { %2881 = vmatprep.mubr.msk.f32.mxu0 %vm60_vm0, %v635_v38  ;;  %v2981_v44 = vpack.c.bf16 %v1168_v43, %v1167_v12 }
  0x63   :  { %2982 = vmatprep.subr.bf16.mxu1 %v2981_v44 }
  0x64   :  { %2882 = vmatmul.mubr.msk.f32.vlgmr.msra.gmra.mrb[44].mxu0 %vm60_vm0, %v3355_v54  ;;  %2984 = vmatpush3.bf16.msra.mxu1 %v2981_v44  ;;  %v3157_v44 = vmov 1966171168  }
  0x65   :  { %2884 = vmatprep.mubr.msk.f32.mxu0 %vm60_vm0, %v663_v41  ;;  %2986 = vmatprep.subr.bf16.mxu1 %v2985_v47  ;;  %v781_v45 = vunpack.c.l.s4 %v3157_v44 }
  0x68   :  { %2885 = vmatmul.mubr.msk.f32.gmra.mrb[46].mxu0 %vm60_vm0, %v677_v42  ;;  %2988 = vmatpush3.bf16.msra.mxu1 %v2985_v47 }
  0xdf   :  { %v3581_v48 = vpop.f32.mrb[0].mxu0 }
  0xe0   :  { %v3583_v49 = vpop.f32.mrb[1].mxu0 }
  0xe3   :  { %v3585_v50 = vpop.f32.mrb[2].mxu0 }
  0xe4   :  { %v3587_v51 = vpop.f32.mrb[3].mxu0 }
  0xe5   :  { %v3621_v4 = vpop.f32.mrb[0].mxu1 }
  0xe6   :  { %4468 = vst [vmem:[#allocation5_spill] sm:$0xff] %v3621_v4  ;;  %v3625_v7 = vpop.f32.mrb[1].mxu1 }
  0xe7   :  { %v3589_v52 = vpop.f32.mrb[4].mxu0  ;;  %4469 = vst [vmem:[#allocation6_spill] sm:$0xff] %v3625_v7 }
  0xe8   :  { %v3591_v53 = vpop.f32.mrb[5].mxu0 }
  0xe9   :  { %v3629_v9 = vpop.f32.mrb[2].mxu1 }
  0xea   :  { %4470 = vst [vmem:[#allocation7_spill] sm:$0xff] %v3629_v9  ;;  %v3631_v15 = vpop.f32.mrb[3].mxu1 }
  0xeb   :  { %v3593_v54 = vpop.f32.mrb[6].mxu0  ;;  %4471 = vst [vmem:[#allocation8_spill] sm:$0xff] %v3631_v15 }
  0xec   :  { %v3595_v55 = vpop.f32.mrb[7].mxu0 }
  0xed   :  { %v3633_v16 = vpop.f32.mrb[4].mxu1 }
  0xee   :  { %4472 = vst [vmem:[#allocation9_spill] sm:$0xff] %v3633_v16  ;;  %v3637_v18 = vpop.f32.mrb[5].mxu1 }
  0xef   :  { %v3597_v56 = vpop.f32.mrb[8].mxu0  ;;  %4473 = vst [vmem:[#allocation10_spill] sm:$0xff] %v3637_v18 }
  0xf0   :  { %v3599_v57 = vpop.f32.mrb[9].mxu0 }
  0xf1   :  { %v3641_v20 = vpop.f32.mrb[6].mxu1 }
  0xf2   :  { %4474 = vst [vmem:[#allocation11_spill] sm:$0xff] %v3641_v20  ;;  %v3643_v5 = vpop.f32.mrb[7].mxu1 }
  0xf3   :  { %v3601_v58 = vpop.f32.mrb[10].mxu0  ;;  %4475 = vst [vmem:[#allocation12_spill] sm:$0xff] %v3643_v5 }
  0xf4   :  { %v3603_v59 = vpop.f32.mrb[11].mxu0 }
  0xf5   :  { %v3645_v13 = vpop.f32.mrb[8].mxu1 }
  0xf6   :  { %4476 = vst [vmem:[#allocation13_spill] sm:$0xff] %v3645_v13  ;;  %v3649_v22 = vpop.f32.mrb[9].mxu1 }
  0xf7   :  { %v3605_v60 = vpop.f32.mrb[12].mxu0  ;;  %4477 = vst [vmem:[#allocation14_spill] sm:$0xff] %v3649_v22 }
  0xf8   :  { %v3607_v61 = vpop.f32.mrb[13].mxu0 }
  0xf9   :  { %v3653_v24 = vpop.f32.mrb[10].mxu1 }
  0xfa   :  { %4478 = vst [vmem:[#allocation15_spill] sm:$0xff] %v3653_v24  ;;  %v3655_v25 = vpop.f32.mrb[11].mxu1 }
  0xfb   :  { %v3609_v62 = vpop.f32.mrb[14].mxu0  ;;  %4479 = vst [vmem:[#allocation16_spill] sm:$0xff] %v3655_v25 }
  0xfc   :  { %v3611_v63 = vpop.f32.mrb[15].mxu0 }
  0xfd   :  { %v3657_v26 = vpop.f32.mrb[12].mxu1 }
  0xfe   :  { %4480 = vst [vmem:[#allocation17_spill] sm:$0xff] %v3657_v26  ;;  %v3661_v28 = vpop.f32.mrb[13].mxu1 }
  0xff   :  { %v3613_v0 = vpop.f32.mrb[16].mxu0  ;;  %4481 = vst [vmem:[#allocation18_spill] sm:$0xff] %v3661_v28 }
 0x100   :  { %v3615_v1 = vpop.f32.mrb[17].mxu0 }
 0x101   :  { %v3665_v30 = vpop.f32.mrb[14].mxu1 }
 0x102   :  { %4482 = vst [vmem:[#allocation19_spill] sm:$0xff] %v3665_v30  ;;  %v3667_v31 = vpop.f32.mrb[15].mxu1 }
 0x103   :  { %v3617_v2 = vpop.f32.mrb[18].mxu0  ;;  %4483 = vst [vmem:[#allocation20_spill] sm:$0xff] %v3667_v31 }
 0x104   :  { %v3619_v3 = vpop.f32.mrb[19].mxu0 }
 0x105   :  { %v3669_v32 = vpop.f32.mrb[16].mxu1 }
 0x106   :  { %4484 = vst [vmem:[#allocation21_spill] sm:$0xff] %v3669_v32  ;;  %v3673_v34 = vpop.f32.mrb[17].mxu1 }
 0x107   :  { %v3623_v6 = vpop.f32.mrb[20].mxu0  ;;  %4485 = vst [vmem:[#allocation22_spill] sm:$0xff] %v3673_v34  ;;  %v784_v34 = vshrl.u32 %v783_v46, 7 }
 0x108   :  { %v3627_v8 = vpop.f32.mrb[21].mxu0 }
 0x109   :  { %v3677_v36 = vpop.f32.mrb[18].mxu1 }
 0x10a   :  { %4486 = vst [vmem:[#allocation23_spill] sm:$0xff] %v3677_v36  ;;  %v3679_v14 = vpop.f32.mrb[19].mxu1  ;;  %v782_v36 = vunpack.c.0.s8 %v781_v45 }
 0x10b   :  { %v3635_v17 = vpop.f32.mrb[22].mxu0  ;;  %4487 = vst [vmem:[#allocation24_spill] sm:$0xff] %v3679_v14 }
 0x10c   :  { %v3639_v19 = vpop.f32.mrb[23].mxu0  ;;  %v3709_v31 = vsub.s32 %v782_v36, %v784_v34 }
 0x10f   :  { %v3647_v21 = vpop.f32.mrb[24].mxu0 }
 0x110   :  { %v3651_v23 = vpop.f32.mrb[25].mxu0 }
 0x113   :  { %v3659_v27 = vpop.f32.mrb[26].mxu0 }
 0x114   :  { %v3663_v29 = vpop.f32.mrb[27].mxu0 }
 0x117   :  { %v3671_v33 = vpop.f32.mrb[28].mxu0 }
 0x118   :  { %v3675_v35 = vpop.f32.mrb[29].mxu0 }
 0x11b   :  { %v3681_v37 = vpop.f32.mrb[30].mxu0 }
 0x11c   :  { %v3683_v38 = vpop.f32.mrb[31].mxu0 }
 0x11f   :  { %v3685_v39 = vpop.f32.mrb[32].mxu0 }
 0x120   :  { %v3687_v40 = vpop.f32.mrb[33].mxu0 }
 0x121   :  { %4488 = vst [vmem:[#allocation25_spill] sm:$0xff] %v3687_v40 }
 0x123   :  { %v3689_v10 = vpop.f32.mrb[34].mxu0 }
 0x124   :  { %4489 = vst [vmem:[#allocation26_spill] sm:$0xff] %v3689_v10  ;;  %v3691_v41 = vpop.f32.mrb[35].mxu0 }
 0x125   :  { %4490 = vst [vmem:[#allocation27_spill] sm:$0xff] %v3691_v41 }
 0x127   :  { %v3693_v11 = vpop.f32.mrb[36].mxu0 }
 0x128   :  { %4491 = vst [vmem:[#allocation28_spill] sm:$0xff] %v3693_v11  ;;  %v3695_v42 = vpop.f32.mrb[37].mxu0 }
 0x129   :  { %4492 = vst [vmem:[#allocation29_spill] sm:$0xff] %v3695_v42 }
 0x12b   :  { %v3697_v12 = vpop.f32.mrb[38].mxu0 }
 0x12c   :  { %4493 = vst [vmem:[#allocation30_spill] sm:$0xff] %v3697_v12  ;;  %v3699_v43 = vpop.f32.mrb[39].mxu0  ;;  %v3712_v12 = vsub.s32 0, %v784_v34 }
 0x12d   :  { %4494 = vst [vmem:[#allocation31_spill] sm:$0xff] %v3699_v43 }
 0x12f   :  { %v3701_v47 = vpop.f32.mrb[40].mxu0 }
 0x130   :  { %4495 = vst [vmem:[#allocation32_spill] sm:$0xff] %v3701_v47  ;;  %v3703_v14 = vpop.f32.mrb[41].mxu0 }
 0x131   :  { %4496 = vst [vmem:[#allocation33_spill] sm:$0xff] %v3703_v14 }
 0x133   :  { %v3705_v24 = vpop.f32.mrb[42].mxu0 }
 0x134   :  { %4497 = vst [vmem:[#allocation34_spill] sm:$0xff] %v3705_v24  ;;  %v3707_v32 = vpop.f32.mrb[43].mxu0 }
 0x135   :  { %4498 = vst [vmem:[#allocation35_spill] sm:$0xff] %v3707_v32 }
 0x137   :  { %v2883_v30 = vpop.f32.mrb[44].mxu0 }
 0x138   :  { %v772_v28 = vmul.f32 0.35355338, %v2883_v30  ;;  %v752_v26 = vpop.f32.mrb[45].mxu0 }
 0x139   :  { %v771_v25 = vmul.f32 0.35355338, %v752_v26 }
 0x13a   :  { %v828_v22 = vcombine.high %v772_v28, %v772_v28  ;;  %v835_v44 = vrot.slane %v772_v28, %v3709_v31 }
 0x13b   :  { %v779_v13 = vcombine.high %v771_v25, %v771_v25  ;;  %v786_v5 = vrot.slane %v771_v25, %v3709_v31  ;;  %v2886_v45 = vpop.f32.mrb[46].mxu0 }
 0x13c   :  { %v842_v46 = vrot.slane %v828_v22, %v3709_v31  ;;  %v843_v20 = vcombine.high %v835_v44, %v835_v44  ;;  %v3717_v18 = vrot.slane %v835_v44, %v3709_v31  ;;  %v774_v36 = vmul.f32 0.35355338, %v2886_v45  ;;  %v762_v16 = vpop.f32.mrb[47].mxu0 }
 0x13d   :  { %v793_v30 = vrot.slane %v779_v13, %v3709_v31  ;;  %v794_v26 = vcombine.high %v786_v5, %v786_v5  ;;  %v802_v15 = vrot.slane %v786_v5, %v3709_v31  ;;  %v773_v28 = vmul.f32 0.35355338, %v762_v16 }
 0x13e   :  { %v844_v34 = vcombine.high %v842_v46, %v842_v46  ;;  %v3722_v9 = vrot.slane %v842_v46, %v3709_v31  ;;  %v3725_v25 = vrot.slane %v843_v20, %v3709_v31  ;;  %v873_v22 = vcombine.high %v3717_v18, %v3717_v18 }
 0x13f   :  { %v795_v45 = vcombine.high %v793_v30, %v793_v30  ;;  %v3732_v13 = vrot.slane %v793_v30, %v3709_v31  ;;  %v816_v5 = vrot.slane %v794_v26, %v3709_v31  ;;  %v824_v26 = vcombine.high %v802_v15, %v802_v15 }
 0x140   :  { %v3736_v16 = vrot.slane %v844_v34, %v3709_v31  ;;  %v1014_v7 = vrot.slane %v3725_v25, %v3712_v12  ;;  %v1018_v44 = vrot.slane %v873_v22, %v3712_v12  ;;  %v978_v20 = vrot.slane %v802_v15, %v3712_v12 }
 0x141   :  { %v3748_v4 = vrot.slane %v795_v45, %v3709_v31  ;;  %v825_v46 = vcombine.high %v3732_v13, %v3732_v13  ;;  %v826_v32 = vcombine.high %v816_v5, %v816_v5  ;;  %v982_v22 = vrot.slane %v816_v5, %v3712_v12 }
 0x142   :  { %v986_v30 = vrot.slane %v824_v26, %v3712_v12  ;;  %v994_v45 = vrot.slane %v3732_v13, %v3712_v12  ;;  %v926_v14 = vcombine.high %v774_v36, %v774_v36  ;;  %v933_v47 = vrot.slane %v774_v36, %v3709_v31 }
 0x143   :  { %v827_v24 = vcombine.high %v3748_v4, %v3748_v4  ;;  %v877_v34 = vcombine.high %v773_v28, %v773_v28  ;;  %v884_v43 = vrot.slane %v773_v28, %v3709_v31  ;;  %v1136_v42 = vmul.f32 %v3581_v48, %v982_v22 }
 0x144   :  { %v1135_v15 = vmul.f32 %v978_v20, %v3583_v49  ;;  %v1137_v11 = vmul.f32 %v986_v30, %v3587_v51  ;;  %v990_v41 = vrot.slane %v826_v32, %v3712_v12  ;;  %v940_v5 = vrot.slane %v926_v14, %v3709_v31 }
 0x145   :  { %v941_v26 = vcombine.high %v933_v47, %v933_v47  ;;  %v3769_v10 = vrot.slane %v933_v47, %v3709_v31  ;;  %v891_v13 = vrot.slane %v877_v34, %v3709_v31  ;;  %v892_v36 = vcombine.high %v884_v43, %v884_v43 }
 0x146   :  { %v900_v40 = vrot.slane %v884_v43, %v3709_v31  ;;  %2895 = vmatprep.mubr.msk.f32.mxu1 %vm60_vm0, %v1135_v15  ;;  %v1138_v48 = vmul.f32 %v3585_v50, %v990_v41  ;;  %v1139_v49 = vmul.f32 %v994_v45, %v3591_v53  ;;  %v942_v51 = vcombine.high %v940_v5, %v940_v5 }
 0x147   :  { %v3777_v32 = vrot.slane %v940_v5, %v3709_v31  ;;  %v963_v14 = vrot.slane %v941_v26, %v3709_v31  ;;  %v971_v47 = vcombine.high %v3769_v10, %v3769_v10  ;;  %2896 = vmatmul.mubr.msk.f32.vlgmr.msra.gmra.mrb[20].mxu1 %vm60_vm0, %v1136_v42  ;;  %v1074_v43 = vrot.slane %v3769_v10, %v3712_v12 }
 0x148   :  { %v893_v28 = vcombine.high %v891_v13, %v891_v13  ;;  %v907_v20 = vrot.slane %v891_v13, %v3709_v31  ;;  %v914_v50 = vrot.slane %v892_v36, %v3709_v31  ;;  %2898 = vmatprep.mubr.msk.f32.mxu1 %vm60_vm0, %v1137_v11  ;;  %v970_v53 = vrot.slane %v942_v51, %v3709_v31 }
 0x149   :  { %v972_v41 = vcombine.high %v3777_v32, %v3777_v32  ;;  %v973_v30 = vcombine.high %v963_v14, %v963_v14  ;;  %v1078_v34 = vrot.slane %v963_v14, %v3712_v12  ;;  %v1082_v42 = vrot.slane %v971_v47, %v3712_v12 }
 0x14a   :  { %v1090_v10 = vrot.slane %v3777_v32, %v3712_v12  ;;  %v921_v22 = vrot.slane %v893_v28, %v3709_v31  ;;  %v922_v45 = vcombine.high %v900_v40, %v900_v40  ;;  %v974_v15 = vcombine.high %v970_v53, %v970_v53 }
 0x14b   :  { %v923_v5 = vcombine.high %v907_v20, %v907_v20  ;;  %v924_v26 = vcombine.high %v914_v50, %v914_v50  ;;  %v1042_v11 = vrot.slane %v900_v40, %v3712_v12  ;;  %2899 = vmatmul.mubr.msk.f32.gmra.mrb[22].mxu1 %vm60_vm0, %v1138_v48  ;;  %v1046_v36 = vrot.slane %v914_v50, %v3712_v12 }
 0x14c   :  { %v925_v13 = vcombine.high %v921_v22, %v921_v22  ;;  %v1050_v51 = vrot.slane %v922_v45, %v3712_v12  ;;  %v1058_v14 = vrot.slane %v907_v20, %v3712_v12  ;;  %2901 = vmatprep.mubr.msk.f32.mxu1 %vm60_vm0, %v1139_v49  ;;  %v998_v31 = vrot.slane %v3748_v4, %v3712_v12 }
 0x14d   :  { %v1002_v32 = vrot.slane %v825_v46, %v3712_v12  ;;  %v1006_v47 = vrot.slane %v827_v24, %v3712_v12  ;;  %v4499_v40 = vrot.slane %v3717_v18, %v3712_v12  ;;  %v1144_v28 = vmul.f32 %v3597_v56, %v1014_v7 }
 0x14e   :  { %v1145_v50 = vmul.f32 %v1018_v44, %v3603_v59  ;;  %v4500_v49 = vcombine.high %v3725_v25, %v3725_v25  ;;  %v4501_v4 = vrot.slane %v3722_v9, %v3712_v12  ;;  %v1140_v24 = vmul.f32 %v3589_v52, %v998_v31 }
 0x14f   :  { %v1143_v48 = vmul.f32 %v4499_v40, %v3599_v57  ;;  %v1141_v45 = vmul.f32 %v1002_v32, %v3595_v55  ;;  %v1142_v57 = vmul.f32 %v3593_v54, %v1006_v47  ;;  %v1030_v56 = vrot.slane %v3736_v16, %v3712_v12 }
 0x150   :  { %v1022_v20 = vrot.slane %v4500_v49, %v3712_v12  ;;  %v1147_v46 = vmul.f32 %v4501_v4, %v3607_v61  ;;  %v4502_v7 = vcombine.high %v3722_v9, %v3722_v9  ;;  %v4503_v61 = vcombine.high %v3736_v16, %v3736_v16  ;;  %2902 = vmatmul.mubr.msk.f32.gmra.mrb[24].mxu1 %vm60_vm0, %v1140_v24 }
 0x151   :  { %v1151_v52 = vmul.f32 %v1042_v11, %v3615_v1  ;;  %v1148_v54 = vmul.f32 %v3605_v60, %v1030_v56  ;;  %v1152_v55 = vmul.f32 %v3613_v0, %v1046_v36  ;;  %v1054_v44 = vrot.slane %v924_v26, %v3712_v12  ;;  %2904 = vmatprep.mubr.msk.f32.mxu1 %vm60_vm0, %v1141_v45 }
 0x152   :  { %v1146_v59 = vmul.f32 %v3601_v58, %v1022_v20  ;;  %v1034_v18 = vrot.slane %v4502_v7, %v3712_v12  ;;  %v1038_v25 = vrot.slane %v4503_v61, %v3712_v12  ;;  %v1153_v58 = vmul.f32 %v1050_v51, %v3619_v3 }
 0x153   :  { %v1155_v16 = vmul.f32 %v1058_v14, %v3627_v8  ;;  %v1062_v1 = vrot.slane %v921_v22, %v3712_v12  ;;  %v1154_v11 = vmul.f32 %v3617_v2, %v1054_v44  ;;  %v1066_v60 = vrot.slane %v923_v5, %v3712_v12 }
 0x154   :  { %v1149_v9 = vmul.f32 %v1034_v18, %v3611_v63  ;;  %v1150_v31 = vmul.f32 %v3609_v62, %v1038_v25  ;;  %v1070_v0 = vrot.slane %v925_v13, %v3712_v12  ;;  %v1159_v3 = vmul.f32 %v1074_v43, %v3651_v23  ;;  %2905 = vmatmul.mubr.msk.f32.gmra.mrb[26].mxu1 %vm60_vm0, %v1142_v57 }
 0x155   :  { %v1156_v26 = vmul.f32 %v3623_v6, %v1062_v1  ;;  %v1160_v36 = vmul.f32 %v3647_v21, %v1078_v34  ;;  %v1161_v63 = vmul.f32 %v1082_v42, %v3663_v29  ;;  %v1086_v62 = vrot.slane %v973_v30, %v3712_v12  ;;  %2907 = vmatprep.mubr.msk.f32.mxu1 %vm60_vm0, %v1143_v48 }
 0x156   :  { %v1157_v8 = vmul.f32 %v1066_v60, %v3639_v19  ;;  %v1158_v2 = vmul.f32 %v3635_v17, %v1070_v0  ;;  %v1163_v22 = vmul.f32 %v1090_v10, %v3675_v35  ;;  %v1094_v5 = vrot.slane %v970_v53, %v3712_v12 }
 0x157   :  { %v1162_v6 = vmul.f32 %v3659_v27, %v1086_v62  ;;  %v1098_v21 = vrot.slane %v972_v41, %v3712_v12  ;;  %v1102_v23 = vrot.slane %v974_v15, %v3712_v12 }
 0x158   :  { %v1164_v29 = vmul.f32 %v3671_v33, %v1094_v5  ;;  %2908 = vmatmul.mubr.msk.f32.gmra.mrb[28].mxu1 %vm60_vm0, %v1144_v28 }
 0x159   :  { %v1165_v43 = vmul.f32 %v1098_v21, %v3683_v38  ;;  %v1166_v19 = vmul.f32 %v3681_v37, %v1102_v23  ;;  %2910 = vmatprep.mubr.msk.f32.mxu1 %vm60_vm0, %v1145_v50 }
 0x15c   :  { %2911 = vmatmul.mubr.msk.f32.gmra.mrb[30].mxu1 %vm60_vm0, %v1146_v59 }
 0x15d   :  { %2913 = vmatprep.mubr.msk.f32.mxu1 %vm60_vm0, %v1147_v46 }
 0x160   :  { %2914 = vmatmul.mubr.msk.f32.gmra.mrb[32].mxu1 %vm60_vm0, %v1148_v54 }
 0x161   :  { %2916 = vmatprep.mubr.msk.f32.mxu1 %vm60_vm0, %v1149_v9 }
 0x164   :  { %2917 = vmatmul.mubr.msk.f32.gmra.mrb[34].mxu1 %vm60_vm0, %v1150_v31 }
 0x165   :  { %2919 = vmatprep.mubr.msk.f32.mxu1 %vm60_vm0, %v1151_v52 }
 0x168   :  { %2920 = vmatmul.mubr.msk.f32.gmra.mrb[36].mxu1 %vm60_vm0, %v1152_v55 }
 0x169   :  { %2922 = vmatprep.mubr.msk.f32.mxu1 %vm60_vm0, %v1153_v58 }
 0x16c   :  { %2923 = vmatmul.mubr.msk.f32.gmra.mrb[38].mxu1 %vm60_vm0, %v1154_v11 }
 0x16d   :  { %2925 = vmatprep.mubr.msk.f32.mxu1 %vm60_vm0, %v1155_v16 }
 0x170   :  { %2926 = vmatmul.mubr.msk.f32.gmra.mrb[40].mxu1 %vm60_vm0, %v1156_v26 }
 0x171   :  { %2928 = vmatprep.mubr.msk.f32.mxu1 %vm60_vm0, %v1157_v8 }
 0x174   :  { %2929 = vmatmul.mubr.msk.f32.gmra.mrb[42].mxu1 %vm60_vm0, %v1158_v2 }
 0x175   :  { %2931 = vmatprep.mubr.msk.f32.mxu1 %vm60_vm0, %v1159_v3 }
 0x178   :  { %2932 = vmatmul.mubr.msk.f32.gmra.mrb[44].mxu1 %vm60_vm0, %v1160_v36 }
 0x179   :  { %2934 = vmatprep.mubr.msk.f32.mxu1 %vm60_vm0, %v1161_v63 }
 0x17c   :  { %2935 = vmatmul.mubr.msk.f32.gmra.mrb[46].mxu1 %vm60_vm0, %v1162_v6 }
 0x17d   :  { %2937 = vmatprep.mubr.msk.f32.mxu1 %vm60_vm0, %v1163_v22 }
 0x180   :  { %2938 = vmatmul.mubr.msk.f32.gmra.mrb[48].mxu1 %vm60_vm0, %v1164_v29 }
 0x181   :  { %2940 = vmatprep.mubr.msk.f32.mxu1 %vm60_vm0, %v1165_v43 }
 0x184   :  { %2941 = vmatmul.mubr.msk.f32.gmra.mrb[50].mxu1 %vm60_vm0, %v1166_v19 }
 0x21a   :  { %v2897_v17 = vpop.f32.mrb[20].mxu1 }
 0x21b   :  { %v1499_v27 = vsel %vm60_vm0, %v2897_v17, -inf  ;;  %v1333_v33 = vpop.f32.mrb[21].mxu1 }
 0x21c   :  { %v1500_v35 = vrot.slane %v1499_v27, 4  ;;  %v1492_v37 = vsel %vm60_vm0, %v1333_v33, -inf }
 0x21d   :  { %v1493_v38 = vrot.slane %v1492_v37, 4 }
 0x21e   :  { %v1501_v12 = vmax.f32 %v1499_v27, %v1500_v35  ;;  %v2900_v53 = vpop.f32.mrb[22].mxu1 }
 0x21f   :  { %v1494_v41 = vmax.f32 %v1492_v37, %v1493_v38  ;;  %v1513_v30 = vsel %vm60_vm0, %v2900_v53, -inf  ;;  %v1343_v34 = vpop.f32.mrb[23].mxu1 }
 0x220   :  { %v1502_v42 = vrot.slane %v1501_v12, 2  ;;  %v1514_v10 = vrot.slane %v1513_v30, 4  ;;  %v1506_v15 = vsel %vm60_vm0, %v1343_v34, -inf }
 0x221   :  { %v1495_v13 = vrot.slane %v1494_v41, 2  ;;  %v1507_v51 = vrot.slane %v1506_v15, 4 }
 0x222   :  { %v1503_v14 = vmax.f32 %v1501_v12, %v1502_v42  ;;  %v1515_v32 = vmax.f32 %v1513_v30, %v1514_v10 }
 0x223   :  { %v1496_v47 = vmax.f32 %v1494_v41, %v1495_v13  ;;  %v1508_v40 = vmax.f32 %v1506_v15, %v1507_v51  ;;  %v3892_v50 = vpop.f32.mrb[24].mxu1 }
 0x224   :  { %v1504_v48 = vrot.slane %v1503_v14, 1  ;;  %v1516_v28 = vrot.slane %v1515_v32, 2  ;;  %v1527_v4 = vsel %vm60_vm0, %v3892_v50, -inf  ;;  %v3896_v46 = vpop.f32.mrb[25].mxu1 }
 0x225   :  { %v1497_v49 = vrot.slane %v1496_v47, 1  ;;  %v1509_v20 = vrot.slane %v1508_v40, 2  ;;  %v1528_v57 = vrot.slane %v1527_v4, 4  ;;  %v1520_v56 = vsel %vm60_vm0, %v3896_v46, -inf }
 0x226   :  { %v1505_v24 = vmax.f32 %v1503_v14, %v1504_v48  ;;  %v1517_v45 = vmax.f32 %v1515_v32, %v1516_v28  ;;  %v1521_v18 = vrot.slane %v1520_v56, 4 }
 0x227   :  { %v1498_v59 = vmax.f32 %v1496_v47, %v1497_v49  ;;  %v1510_v7 = vmax.f32 %v1508_v40, %v1509_v20  ;;  %v1529_v52 = vmax.f32 %v1527_v4, %v1528_v57  ;;  %v3900_v54 = vpop.f32.mrb[26].mxu1 }
 0x228   :  { %v1717_v61 = vsub.f32 %v2897_v17, %v1505_v24  ;;  %v1518_v25 = vrot.slane %v1517_v45, 1  ;;  %v1522_v44 = vmax.f32 %v1520_v56, %v1521_v18  ;;  %v1541_v9 = vsel %vm60_vm0, %v3900_v54, -inf  ;;  %v3904_v31 = vpop.f32.mrb[27].mxu1 }
 0x229   :  { %v1716_v55 = vsub.f32 %v1333_v33, %v1498_v59  ;;  %v1511_v58 = vrot.slane %v1510_v7, 1  ;;  %v1530_v11 = vrot.slane %v1529_v52, 2  ;;  %v1542_v60 = vrot.slane %v1541_v9, 4 }
 0x22a   :  { %v1750_v16 = vmul.f32 1.442695, %v1717_v61  ;;  %v1519_v1 = vmax.f32 %v1517_v45, %v1518_v25  ;;  %v1523_v26 = vrot.slane %v1522_v44, 2  ;;  %v1534_v36 = vsel %vm60_vm0, %v3904_v31, -inf }
 0x22b   :  { %v1748_v0 = vmul.f32 1.442695, %v1716_v55  ;;  %v1512_v3 = vmax.f32 %v1510_v7, %v1511_v58  ;;  %v1531_v62 = vmax.f32 %v1529_v52, %v1530_v11  ;;  %v1543_v8 = vmax.f32 %v1541_v9, %v1542_v60  ;;  %v3908_v2 = vpop.f32.mrb[28].mxu1 }
 0x22c   :  { %3005 = vpow2.f32 %v1750_v16  ;;  %v1719_v63 = vsub.f32 %v2900_v53, %v1519_v1  ;;  %v1524_v5 = vmax.f32 %v1522_v44, %v1523_v26  ;;  %v1535_v6 = vrot.slane %v1534_v36, 4  ;;  %v3910_v21 = vpop.f32.mrb[29].mxu1 }
 0x22d   :  { %3007 = vpow2.f32 %v1748_v0  ;;  %v1718_v22 = vsub.f32 %v1343_v34, %v1512_v3  ;;  %v1532_v29 = vrot.slane %v1531_v62, 1  ;;  %v1544_v43 = vrot.slane %v1543_v8, 2 }
 0x22e   :  { %v1754_v23 = vmul.f32 1.442695, %v1719_v63  ;;  %v1555_v19 = vsel %vm60_vm0, %v3908_v2, -inf  ;;  %v1525_v27 = vrot.slane %v1524_v5, 1  ;;  %v1536_v33 = vmax.f32 %v1534_v36, %v1535_v6 }
 0x22f   :  { %v1752_v17 = vmul.f32 1.442695, %v1718_v22  ;;  %v1556_v35 = vrot.slane %v1555_v19, 4  ;;  %v1533_v37 = vmax.f32 %v1531_v62, %v1532_v29  ;;  %v1545_v38 = vmax.f32 %v1543_v8, %v1544_v43  ;;  %v3916_v53 = vpop.f32.mrb[30].mxu1 }
 0x230   :  { %3009 = vpow2.f32 %v1754_v23  ;;  %v1548_v12 = vsel %vm60_vm0, %v3910_v21, -inf  ;;  %v1526_v41 = vmax.f32 %v1524_v5, %v1525_v27  ;;  %v1537_v30 = vrot.slane %v1536_v33, 2  ;;  %v3918_v42 = vpop.f32.mrb[31].mxu1 }
 0x231   :  { %3011 = vpow2.f32 %v1752_v17  ;;  %v1557_v34 = vmax.f32 %v1555_v19, %v1556_v35  ;;  %v1721_v10 = vsub.f32 %v3892_v50, %v1533_v37  ;;  %v1546_v15 = vrot.slane %v1545_v38, 1 }
 0x232   :  { %v1549_v13 = vrot.slane %v1548_v12, 4  ;;  %v1569_v51 = vsel %vm60_vm0, %v3916_v53, -inf  ;;  %v1720_v14 = vsub.f32 %v3896_v46, %v1526_v41  ;;  %v1538_v32 = vmax.f32 %v1536_v33, %v1537_v30 }
 0x233   :  { %v1558_v47 = vrot.slane %v1557_v34, 2  ;;  %v1570_v40 = vrot.slane %v1569_v51, 4  ;;  %v1758_v48 = vmul.f32 1.442695, %v1721_v10  ;;  %v1547_v28 = vmax.f32 %v1545_v38, %v1546_v15  ;;  %v3926_v4 = vpop.f32.mrb[32].mxu1 }
 0x234   :  { %v1550_v49 = vmax.f32 %v1548_v12, %v1549_v13  ;;  %v1562_v20 = vsel %vm60_vm0, %v3918_v42, -inf  ;;  %v1756_v24 = vmul.f32 1.442695, %v1720_v14  ;;  %v1539_v50 = vrot.slane %v1538_v32, 1  ;;  %v3928_v56 = vpop.f32.mrb[33].mxu1 }
 0x235   :  { %v1559_v45 = vmax.f32 %v1557_v34, %v1558_v47  ;;  %v1571_v57 = vmax.f32 %v1569_v51, %v1570_v40  ;;  %3013 = vpow2.f32 %v1758_v48  ;;  %v1723_v46 = vsub.f32 %v3900_v54, %v1547_v28 }
 0x236   :  { %v3930_v59 = vpop.eup %3005  ;;  %v1551_v7 = vrot.slane %v1550_v49, 2  ;;  %v1563_v18 = vrot.slane %v1562_v20, 4  ;;  %3015 = vpow2.f32 %v1756_v24  ;;  %v1540_v52 = vmax.f32 %v1538_v32, %v1539_v50 }
 0x237   :  { %v3933_v61 = vpop.eup %3007  ;;  %v1819_v25 = vsel %vm60_vm0, %v3930_v59, 0.0  ;;  %v1560_v55 = vrot.slane %v1559_v45, 1  ;;  %v1762_v9 = vmul.f32 1.442695, %v1723_v46  ;;  %v3939_v1 = vpop.f32.mrb[34].mxu1  ;;  %v1572_v0 = vrot.slane %v1571_v57, 2 }
 0x238   :  { %v1820_v58 = vrot.slane %v1819_v25, 4  ;;  %v1812_v44 = vsel %vm60_vm0, %v3933_v61, 0.0  ;;  %v1552_v16 = vmax.f32 %v1550_v49, %v1551_v7  ;;  %v1722_v54 = vsub.f32 %v3904_v31, %v1540_v52  ;;  %v3942_v3 = vpop.f32.mrb[35].mxu1 }
 0x239   :  { %v1813_v11 = vrot.slane %v1812_v44, 4  ;;  %v1561_v60 = vmax.f32 %v1559_v45, %v1560_v55  ;;  %3017 = vpow2.f32 %v1762_v9  ;;  %v1564_v62 = vmax.f32 %v1562_v20, %v1563_v18 }
 0x23a   :  { %v3944_v26 = vpop.eup %3009  ;;  %v1821_v36 = vadd.f32 %v1820_v58, %v1819_v25  ;;  %v1553_v63 = vrot.slane %v1552_v16, 1  ;;  %v1760_v6 = vmul.f32 1.442695, %v1722_v54  ;;  %v1573_v30 = vmax.f32 %v1571_v57, %v1572_v0 }
 0x23b   :  { %v3946_v8 = vpop.eup %3011  ;;  %v1814_v22 = vadd.f32 %v1813_v11, %v1812_v44  ;;  %v1833_v5 = vsel %vm60_vm0, %v3944_v26, 0.0  ;;  %v1725_v23 = vsub.f32 %v3908_v2, %v1561_v60  ;;  %v3953_v17 = vpop.f32.mrb[36].mxu1  ;;  %v1565_v10 = vrot.slane %v1564_v62, 2 }
 0x23c   :  { %v1822_v31 = vrot.slane %v1821_v36, 2  ;;  %v1834_v29 = vrot.slane %v1833_v5, 4  ;;  %v1826_v43 = vsel %vm60_vm0, %v3946_v8, 0.0  ;;  %v1554_v19 = vmax.f32 %v1552_v16, %v1553_v63  ;;  %v3955_v37 = vpop.f32.mrb[37].mxu1 }
 0x23d   :  { %v1815_v27 = vrot.slane %v1814_v22, 2  ;;  %v1827_v33 = vrot.slane %v1826_v43, 4  ;;  %3019 = vpow2.f32 %v1760_v6  ;;  %v1766_v35 = vmul.f32 1.442695, %v1725_v23 }
 0x23e   :  { %v1823_v38 = vadd.f32 %v1822_v31, %v1821_v36  ;;  %v1835_v12 = vadd.f32 %v1834_v29, %v1833_v5  ;;  %v1724_v41 = vsub.f32 %v3910_v21, %v1554_v19  ;;  %v1574_v32 = vrot.slane %v1573_v30, 1 }
 0x23f   :  { %v1816_v2 = vadd.f32 %v1815_v27, %v1814_v22  ;;  %v1828_v34 = vadd.f32 %v1827_v33, %v1826_v43  ;;  %3021 = vpow2.f32 %v1766_v35  ;;  %v3958_v15 = vpop.eup %3013  ;;  %v3960_v47 = vpop.f32.mrb[38].mxu1  ;;  %v1566_v49 = vmax.f32 %v1564_v62, %v1565_v10 }
 0x240   :  { %v1824_v13 = vrot.slane %v1823_v38, 1  ;;  %v1836_v51 = vrot.slane %v1835_v12, 2  ;;  %v1764_v14 = vmul.f32 1.442695, %v1724_v41  ;;  %v3962_v40 = vpop.eup %3015  ;;  %v1847_v21 = vsel %vm60_vm0, %v3958_v15, 0.0  ;;  %v3966_v20 = vpop.f32.mrb[39].mxu1 }
 0x241   :  { %v1817_v48 = vrot.slane %v1816_v2, 1  ;;  %v1829_v28 = vrot.slane %v1828_v34, 2  ;;  %v1848_v45 = vrot.slane %v1847_v21, 4  ;;  %v1840_v57 = vsel %vm60_vm0, %v3962_v40, 0.0 }
 0x242   :  { %v1825_v24 = vadd.f32 %v1824_v13, %v1823_v38  ;;  %v1837_v50 = vadd.f32 %v1836_v51, %v1835_v12  ;;  %v1841_v18 = vrot.slane %v1840_v57, 4  ;;  %3023 = vpow2.f32 %v1764_v14 }
 0x243   :  { %v1818_v46 = vadd.f32 %v1817_v48, %v1816_v2  ;;  %v1830_v7 = vadd.f32 %v1829_v28, %v1828_v34  ;;  %v3970_v25 = vpop.eup %3017  ;;  %v1849_v55 = vadd.f32 %v1848_v45, %v1847_v21  ;;  %v1575_v58 = vmax.f32 %v1573_v30, %v1574_v32  ;;  %v3972_v44 = vpop.f32.mrb[40].mxu1 }
 0x244   :  { %3025 = vrcp.f32 %v1825_v24  ;;  %v1838_v52 = vrot.slane %v1837_v50, 1  ;;  %v1842_v16 = vadd.f32 %v1841_v18, %v1840_v57  ;;  %v1861_v11 = vsel %vm60_vm0, %v3970_v25, 0.0  ;;  %v3976_v54 = vpop.f32.mrb[41].mxu1 }
 0x245   :  { %3027 = vrcp.f32 %v1818_v46  ;;  %v1831_v9 = vrot.slane %v1830_v7, 1  ;;  %v1850_v0 = vrot.slane %v1849_v55, 2  ;;  %v1862_v36 = vrot.slane %v1861_v11, 4 }
 0x246   :  { %v1839_v60 = vadd.f32 %v1838_v52, %v1837_v50  ;;  %v1727_v63 = vsub.f32 %v3916_v53, %v1575_v58  ;;  %v1843_v5 = vrot.slane %v1842_v16, 2  ;;  %v1567_v6 = vrot.slane %v1566_v49, 1 }
 0x247   :  { %v3979_v62 = vpop.eup %3019  ;;  %v1832_v22 = vadd.f32 %v1831_v9, %v1830_v7  ;;  %v1583_v23 = vsel %vm60_vm0, %v3926_v4, -inf  ;;  %v1851_v31 = vadd.f32 %v1850_v0, %v1849_v55  ;;  %v1863_v29 = vadd.f32 %v1862_v36, %v1861_v11  ;;  %v3985_v19 = vpop.f32.mrb[42].mxu1 }
 0x248   :  { %3029 = vrcp.f32 %v1839_v60  ;;  %v1854_v43 = vsel %vm60_vm0, %v3979_v62, 0.0  ;;  %v1844_v53 = vadd.f32 %v1843_v5, %v1842_v16  ;;  %v1770_v35 = vmul.f32 1.442695, %v1727_v63  ;;  %v3989_v38 = vpop.f32.mrb[43].mxu1 }
 0x249   :  { %v3987_v27 = vpop.eup %3021  ;;  %3031 = vrcp.f32 %v1832_v22  ;;  %v1855_v33 = vrot.slane %v1854_v43, 4  ;;  %v1852_v12 = vrot.slane %v1851_v31, 1  ;;  %v1864_v41 = vrot.slane %v1863_v29, 2 }
 0x24a   :  { %v1875_v30 = vsel %vm60_vm0, %v3987_v27, 0.0  ;;  %v1568_v2 = vmax.f32 %v1566_v49, %v1567_v6  ;;  %v1845_v34 = vrot.slane %v1844_v53, 1  ;;  %3033 = vpow2.f32 %v1770_v35 }
 0x24b   :  { %v1856_v10 = vadd.f32 %v1855_v33, %v1854_v43  ;;  %v1876_v13 = vrot.slane %v1875_v30, 4  ;;  %v1853_v51 = vadd.f32 %v1852_v12, %v1851_v31  ;;  %v1865_v14 = vadd.f32 %v1864_v41, %v1863_v29  ;;  %v3994_v28 = vpop.f32.mrb[44].mxu1 }
 0x24c   :  { %v1726_v32 = vsub.f32 %v3918_v42, %v1568_v2  ;;  %v1584_v48 = vrot.slane %v1583_v23, 4  ;;  %v3996_v21 = vpop.eup %3023  ;;  %v1846_v24 = vadd.f32 %v1845_v34, %v1844_v53  ;;  %v4000_v57 = vsel %vm60_vm0, %v3928_v56, -inf  ;;  %v4002_v49 = vpop.f32.mrb[45].mxu1 }
 0x24d   :  { %v1857_v50 = vrot.slane %v1856_v10, 2  ;;  %v1877_v45 = vadd.f32 %v1876_v13, %v1875_v30  ;;  %3035 = vrcp.f32 %v1853_v51  ;;  %v1866_v7 = vrot.slane %v1865_v14, 1  ;;  %v4505_v51 = vld [vmem:[#allocation26_spill] sm:$0xff] }
 0x24e   :  { %v3026_v46 = vpop.eup %3025  ;;  %v1868_v42 = vsel %vm60_vm0, %v3996_v21, 0.0  ;;  %v1768_v18 = vmul.f32 1.442695, %v1726_v32  ;;  %3037 = vrcp.f32 %v1846_v24  ;;  %v4011_v5 = vmax.f32 %v1583_v23, %v1584_v48  ;;  %v4506_v24 = vld [vmem:[#allocation27_spill] sm:$0xff] }
 0x24f   :  { %v3028_v52 = vpop.eup %3027  ;;  %v2069_v55 = vmul.f32 %v3026_v46, %v3930_v59  ;;  %v1858_v58 = vadd.f32 %v1857_v50, %v1856_v10  ;;  %v1878_v9 = vrot.slane %v1877_v45, 2  ;;  %v1867_v11 = vadd.f32 %v1866_v7, %v1865_v14  ;;  %v4008_v0 = vpop.f32.mrb[46].mxu1  ;;  %v4504_v59 = vld [vmem:[#allocation25_spill] sm:$0xff] }
 0x250   :  { %v2068_v16 = vmul.f32 %v3028_v52, %v3933_v61  ;;  %v1869_v60 = vrot.slane %v1868_v42, 4  ;;  %3039 = vpow2.f32 %v1768_v18  ;;  %v4013_v6 = vpop.f32.mrb[47].mxu1  ;;  %v1577_v61 = vrot.slane %v4000_v57, 4 }
 0x251   :  { %v2101_v36 = vmul.f32 %v3685_v39, %v2069_v55  ;;  %v1859_v63 = vrot.slane %v1858_v58, 1  ;;  %v1879_v22 = vadd.f32 %v1878_v9, %v1877_v45  ;;  %3041 = vrcp.f32 %v1867_v11 }
 0x252   :  { %v3030_v31 = vpop.eup %3029  ;;  %v2100_v29 = vmul.f32 %v2068_v16, %v4504_v59  ;;  %v1870_v43 = vadd.f32 %v1869_v60, %v1868_v42 }
 0x253   :  { %v3032_v53 = vpop.eup %3031  ;;  %v2139_v33 = vsel %vm60_vm0, %v2101_v36, 0.0  ;;  %v2071_v35 = vmul.f32 %v3030_v31, %v3944_v26  ;;  %v1860_v12 = vadd.f32 %v1859_v63, %v1858_v58  ;;  %v1880_v39 = vrot.slane %v1879_v22, 1  ;;  %v4021_v34 = vpop.f32.mrb[48].mxu1 }
 0x254   :  { %v2140_v41 = vrot.slane %v2139_v33, 4  ;;  %v2132_v23 = vsel %vm60_vm0, %v2100_v29, 0.0  ;;  %v2070_v30 = vmul.f32 %v3032_v53, %v3946_v8  ;;  %v1871_v2 = vrot.slane %v1870_v43, 2  ;;  %v4023_v10 = vpop.eup %3033  ;;  %v4026_v48 = vpop.f32.mrb[49].mxu1 }
 0x255   :  { %v2133_v13 = vrot.slane %v2132_v23, 4  ;;  %v2103_v14 = vmul.f32 %v4505_v51, %v2071_v35  ;;  %3043 = vrcp.f32 %v1860_v12  ;;  %v1881_v32 = vadd.f32 %v1880_v39, %v1879_v22  ;;  %v4507_v39 = vld [vmem:[#allocation28_spill] sm:$0xff] }
 0x256   :  { %v2141_v26 = vadd.f32 %v2140_v41, %v2139_v33  ;;  %v2102_v50 = vmul.f32 %v2070_v30, %v4506_v24  ;;  %v1872_v45 = vadd.f32 %v1871_v2, %v1870_v43  ;;  %v1889_v46 = vsel %vm60_vm0, %v4023_v10, 0.0 }
 0x257   :  { %v2134_v8 = vadd.f32 %v2133_v13, %v2132_v23  ;;  %v2153_v7 = vsel %vm60_vm0, %v2103_v14, 0.0  ;;  %3045 = vrcp.f32 %v1881_v32  ;;  %v1890_v42 = vrot.slane %v1889_v46, 4  ;;  %v3036_v18 = vpop.eup %3035  ;;  %v4033_v16 = vpop.f32.mrb[50].mxu1  ;;  %v4508_v13 = vld [vmem:[#allocation29_spill] sm:$0xff] }
 0x258   :  { %v2142_v52 = vrot.slane %v2141_v26, 2  ;;  %v2154_v55 = vrot.slane %v2153_v7, 4  ;;  %v2146_v58 = vsel %vm60_vm0, %v2102_v50, 0.0  ;;  %v1873_v9 = vrot.slane %v1872_v45, 1  ;;  %v3038_v11 = vpop.eup %3037  ;;  %v4036_v31 = vpop.f32.mrb[51].mxu1 }
 0x259   :  { %v2135_v60 = vrot.slane %v2134_v8, 2  ;;  %v2147_v36 = vrot.slane %v2146_v58, 4  ;;  %v2073_v63 = vmul.f32 %v3036_v18, %v3958_v15  ;;  %v1891_v22 = vadd.f32 %v1890_v42, %v1889_v46 }
 0x25a   :  { %v4038_v59 = vpop.eup %3039  ;;  %v4040_v29 = vadd.f32 %v2142_v52, %v2141_v26  ;;  %v4042_v43 = vadd.f32 %v2154_v55, %v2153_v7  ;;  %v2072_v53 = vmul.f32 %v3038_v11, %v3962_v40  ;;  %v1874_v33 = vadd.f32 %v1873_v9, %v1872_v45 }
 0x25b   :  { %v4045_v35 = vadd.f32 %v2135_v60, %v2134_v8  ;;  %v2148_v12 = vadd.f32 %v2147_v36, %v2146_v58  ;;  %v4048_v41 = vmul.f32 %v4507_v39, %v2073_v63  ;;  %v1892_v23 = vrot.slane %v1891_v22, 2  ;;  %v3042_v15 = vpop.eup %3041 }
 0x25c   :  { %v2144_v30 = vrot.slane %v4040_v29, 1  ;;  %v2156_v2 = vrot.slane %v4042_v43, 2  ;;  %v2104_v51 = vmul.f32 %v2072_v53, %v4508_v13  ;;  %3047 = vrcp.f32 %v1874_v33 }
 0x25d   :  { %v2137_v14 = vrot.slane %v4045_v35, 1  ;;  %v2149_v32 = vrot.slane %v2148_v12, 2  ;;  %v4055_v40 = vmul.f32 %v3042_v15, %v3970_v25  ;;  %v1893_v26 = vadd.f32 %v1892_v23, %v1891_v22  ;;  %v4510_v23 = vld [vmem:[#allocation32_spill] sm:$0xff] }
 0x25e   :  { %v4058_v24 = vsel %vm60_vm0, %v2104_v51, 0.0  ;;  %v1882_v50 = vsel %vm60_vm0, %v4038_v59, 0.0  ;;  %v1586_v45 = vrot.slane %v4011_v5, 2  ;;  %v1578_v46 = vmax.f32 %v4000_v57, %v1577_v61  ;;  %v4509_v61 = vld [vmem:[#allocation31_spill] sm:$0xff] }
 0x25f   :  { %v3044_v8 = vpop.eup %3043  ;;  %v4064_v7 = vadd.f32 %v2149_v32, %v2148_v12  ;;  %v2161_v42 = vrot.slane %v4058_v24, 4  ;;  %v1894_v18 = vrot.slane %v1893_v26, 1  ;;  %v1883_v52 = vrot.slane %v1882_v50, 4 }
 0x260   :  { %v2074_v25 = vmul.f32 %v3044_v8, %v3979_v62  ;;  %v1587_v55 = vmax.f32 %v4011_v5, %v1586_v45  ;;  %v1579_v58 = vrot.slane %v1578_v46, 2  ;;  %v1597_v9 = vsel %vm60_vm0, %v3939_v1, -inf }
 0x261   :  { %v3046_v11 = vpop.eup %3045  ;;  %v1895_v60 = vadd.f32 %v1894_v18, %v1893_v26  ;;  %v1884_v36 = vadd.f32 %v1883_v52, %v1882_v50  ;;  %v1598_v63 = vrot.slane %v1597_v9, 4  ;;  %v1590_v57 = vsel %vm60_vm0, %v3942_v3, -inf }
 0x262   :  { %v4074_v22 = vmul.f32 %v2074_v25, %v4509_v61  ;;  %v2077_v53 = vmul.f32 %v3046_v11, %v3987_v27  ;;  %v1588_v33 = vrot.slane %v1587_v55, 1  ;;  %v1580_v62 = vmax.f32 %v1578_v46, %v1579_v58 }
 0x263   :  { %3049 = vrcp.f32 %v1895_v60  ;;  %v1885_v5 = vrot.slane %v1884_v36, 2  ;;  %v1599_v12 = vmax.f32 %v1597_v9, %v1598_v63  ;;  %v1591_v39 = vrot.slane %v1590_v57, 4 }
 0x264   :  { %v2109_v15 = vmul.f32 %v4510_v23, %v2077_v53  ;;  %v1589_v13 = vmax.f32 %v1587_v55, %v1588_v33  ;;  %v1581_v51 = vrot.slane %v1580_v62, 1  ;;  %v1611_v32 = vsel %vm60_vm0, %v3953_v17, -inf  ;;  %v4511_v53 = vld [vmem:[#allocation33_spill] sm:$0xff] }
 0x265   :  { %v1886_v26 = vadd.f32 %v1885_v5, %v1884_v36  ;;  %v1600_v50 = vrot.slane %v1599_v12, 2  ;;  %v1592_v45 = vmax.f32 %v1590_v57, %v1591_v39  ;;  %v1612_v8 = vrot.slane %v1611_v32, 4 }
 0x266   :  { %v3048_v18 = vpop.eup %3047  ;;  %v2195_v27 = vsel %vm60_vm0, %v2109_v15, 0.0  ;;  %v1729_v46 = vsub.f32 %v3926_v4, %v1589_v13  ;;  %v1582_v52 = vmax.f32 %v1580_v62, %v1581_v51  ;;  %v1604_v25 = vsel %vm60_vm0, %v3955_v37, -inf }
 0x267   :  { %v2196_v58 = vrot.slane %v2195_v27, 4  ;;  %v2076_v55 = vmul.f32 %v3048_v18, %v3996_v21  ;;  %v1887_v9 = vrot.slane %v1886_v26, 1  ;;  %v1601_v11 = vmax.f32 %v1599_v12, %v1600_v50 }
 0x268   :  { %v1774_v60 = vmul.f32 1.442695, %v1729_v46  ;;  %v1728_v36 = vsub.f32 %v3928_v56, %v1582_v52  ;;  %v1593_v63 = vrot.slane %v1592_v45, 2  ;;  %v1613_v57 = vmax.f32 %v1611_v32, %v1612_v8 }
 0x269   :  { %v2197_v61 = vadd.f32 %v2196_v58, %v2195_v27  ;;  %v2108_v33 = vmul.f32 %v2076_v55, %v4511_v53  ;;  %v1888_v5 = vadd.f32 %v1887_v9, %v1886_v26  ;;  %v1602_v39 = vrot.slane %v1601_v11, 1 }
 0x26a   :  { %3051 = vpow2.f32 %v1774_v60  ;;  %v1772_v4 = vmul.f32 1.442695, %v1728_v36  ;;  %v1594_v62 = vmax.f32 %v1592_v45, %v1593_v63  ;;  %v1614_v23 = vrot.slane %v1613_v57, 2  ;;  %v4512_v36 = vld [vmem:[#allocation34_spill] sm:$0xff] }
 0x26b   :  { %v2198_v15 = vrot.slane %v2197_v61, 2  ;;  %v2188_v13 = vsel %vm60_vm0, %v2108_v33, 0.0  ;;  %3053 = vrcp.f32 %v1888_v5  ;;  %v1603_v21 = vmax.f32 %v1601_v11, %v1602_v39 }
 0x26c   :  { %v2189_v12 = vrot.slane %v2188_v13, 4  ;;  %3055 = vpow2.f32 %v1772_v4  ;;  %v1595_v51 = vrot.slane %v1594_v62, 1  ;;  %v1615_v56 = vmax.f32 %v1613_v57, %v1614_v23 }
 0x26d   :  { %v3050_v50 = vpop.eup %3049  ;;  %v2199_v32 = vadd.f32 %v2198_v15, %v2197_v61  ;;  %v1731_v8 = vsub.f32 %v3939_v1, %v1603_v21  ;;  %v1605_v18 = vrot.slane %v1604_v25, 4  ;;  %v1625_v26 = vsel %vm60_vm0, %v3960_v47, -inf }
 0x26e   :  { %v2190_v27 = vadd.f32 %v2189_v12, %v2188_v13  ;;  %v2079_v45 = vmul.f32 %v3050_v50, %v4023_v10  ;;  %v1596_v46 = vmax.f32 %v1594_v62, %v1595_v51  ;;  %v1616_v52 = vrot.slane %v1615_v56, 1 }
 0x26f   :  { %v2200_v58 = vrot.slane %v2199_v32, 1  ;;  %v1778_v55 = vmul.f32 1.442695, %v1731_v8  ;;  %v1606_v9 = vmax.f32 %v1604_v25, %v1605_v18  ;;  %v1626_v11 = vrot.slane %v1625_v26, 4 }
 0x270   :  { %v2191_v60 = vrot.slane %v2190_v27, 2  ;;  %v2111_v63 = vmul.f32 %v4512_v36, %v2079_v45  ;;  %v1730_v57 = vsub.f32 %v3942_v3, %v1596_v46  ;;  %v1617_v61 = vmax.f32 %v1615_v56, %v1616_v52 }
 0x271   :  { %v4094_v1 = vadd.f32 %v2200_v58, %v2199_v32  ;;  %3057 = vpow2.f32 %v1778_v55  ;;  %v1607_v53 = vrot.slane %v1606_v9, 2  ;;  %v1627_v33 = vmax.f32 %v1625_v26, %v1626_v11  ;;  %v4513_v55 = vld [vmem:[#allocation35_spill] sm:$0xff] }
 0x272   :  { %v2192_v5 = vadd.f32 %v2191_v60, %v2190_v27  ;;  %v2209_v10 = vsel %vm60_vm0, %v2111_v63, 0.0  ;;  %v1776_v39 = vmul.f32 1.442695, %v1730_v57  ;;  %v1733_v4 = vsub.f32 %v3953_v17, %v1617_v61 }
 0x273   :  { %v2210_v62 = vrot.slane %v2209_v10, 4  ;;  %v1608_v25 = vmax.f32 %v1606_v9, %v1607_v53  ;;  %v1628_v23 = vrot.slane %v1627_v33, 2  ;;  %v1618_v15 = vsel %vm60_vm0, %v3966_v20, -inf }
 0x274   :  { %v4100_v13 = vpop.eup %3051  ;;  %v2193_v3 = vrot.slane %v2192_v5, 1  ;;  %3059 = vpow2.f32 %v1776_v39  ;;  %v1782_v21 = vmul.f32 1.442695, %v1733_v4  ;;  %v1619_v12 = vrot.slane %v1618_v15, 4 }
 0x275   :  { %v3054_v51 = vpop.eup %3053  ;;  %v2211_v56 = vadd.f32 %v2210_v62, %v2209_v10  ;;  %v1903_v50 = vsel %vm60_vm0, %v4100_v13, 0.0  ;;  %v1609_v32 = vrot.slane %v1608_v25, 1  ;;  %v1629_v8 = vmax.f32 %v1627_v33, %v1628_v23 }
 0x276   :  { %v4104_v17 = vpop.eup %3055  ;;  %v4106_v18 = vadd.f32 %v2193_v3, %v2192_v5  ;;  %v2078_v26 = vmul.f32 %v3054_v51, %v4038_v59  ;;  %v1904_v27 = vrot.slane %v1903_v50, 4  ;;  %3061 = vpow2.f32 %v1782_v21 }
 0x277   :  { %v2212_v45 = vrot.slane %v2211_v56, 2  ;;  %v1896_v46 = vsel %vm60_vm0, %v4104_v17, 0.0  ;;  %v1610_v52 = vmax.f32 %v1608_v25, %v1609_v32  ;;  %v1630_v58 = vrot.slane %v1629_v8, 1 }
 0x278   :  { %v2110_v9 = vmul.f32 %v2078_v26, %v4513_v55  ;;  %v1905_v11 = vadd.f32 %v1904_v27, %v1903_v50  ;;  %v1897_v60 = vrot.slane %v1896_v46, 4  ;;  %v1620_v36 = vmax.f32 %v1618_v15, %v1619_v12 }
 0x279   :  { %v4112_v63 = vadd.f32 %v2212_v45, %v2211_v56  ;;  %v1732_v57 = vsub.f32 %v3955_v37, %v1610_v52  ;;  %v1631_v61 = vmax.f32 %v1629_v8, %v1630_v58  ;;  %v1639_v59 = vsel %vm60_vm0, %v3972_v44, -inf }
 0x27a   :  { %v2202_v53 = vsel %vm60_vm0, %v2110_v9, 0.0  ;;  %v1906_v33 = vrot.slane %v1905_v11, 2  ;;  %v1898_v5 = vadd.f32 %v1897_v60, %v1896_v46  ;;  %v1621_v10 = vrot.slane %v1620_v36, 2 }
 0x27b   :  { %v4118_v39 = vpop.eup %3057  ;;  %v2203_v62 = vrot.slane %v2202_v53, 4  ;;  %v1780_v25 = vmul.f32 1.442695, %v1732_v57  ;;  %v1735_v23 = vsub.f32 %v3960_v47, %v1631_v61  ;;  %v1640_v27 = vrot.slane %v1639_v59, 4 }
 0x27c   :  { %v1907_v15 = vadd.f32 %v1906_v33, %v1905_v11  ;;  %v1899_v3 = vrot.slane %v1898_v5, 2  ;;  %v1917_v37 = vsel %vm60_vm0, %v4118_v39, 0.0  ;;  %v1622_v21 = vmax.f32 %v1620_v36, %v1621_v10 }
 0x27d   :  { %v2204_v12 = vadd.f32 %v2203_v62, %v2202_v53  ;;  %v1918_v51 = vrot.slane %v1917_v37, 4  ;;  %3063 = vpow2.f32 %v1780_v25  ;;  %v1786_v56 = vmul.f32 1.442695, %v1735_v23 }
 0x27e   :  { %v4124_v50 = vpop.eup %3059  ;;  %v1908_v32 = vrot.slane %v1907_v15, 1  ;;  %v1900_v8 = vadd.f32 %v1899_v3, %v1898_v5  ;;  %v1623_v26 = vrot.slane %v1622_v21, 1  ;;  %v1641_v61 = vmax.f32 %v1639_v59, %v1640_v27 }
 0x27f   :  { %v2205_v45 = vrot.slane %v2204_v12, 2  ;;  %v1919_v46 = vadd.f32 %v1918_v51, %v1917_v37  ;;  %v1910_v47 = vsel %vm60_vm0, %v4124_v50, 0.0  ;;  %3065 = vpow2.f32 %v1786_v56 }
 0x280   :  { %v4128_v52 = vpop.eup %3061  ;;  %v1909_v58 = vadd.f32 %v1908_v32, %v1907_v15  ;;  %v1901_v55 = vrot.slane %v1900_v8, 1  ;;  %v1911_v9 = vrot.slane %v1910_v47, 4  ;;  %v1624_v11 = vmax.f32 %v1622_v21, %v1623_v26 }
 0x281   :  { %v2206_v60 = vadd.f32 %v2205_v45, %v2204_v12  ;;  %v1920_v36 = vrot.slane %v1919_v46, 2  ;;  %v1931_v57 = vsel %vm60_vm0, %v4128_v52, 0.0  ;;  %v1642_v23 = vrot.slane %v1641_v61, 2 }
 0x282   :  { %3067 = vrcp.f32 %v1909_v58  ;;  %v1902_v53 = vadd.f32 %v1901_v55, %v1900_v8  ;;  %v1912_v33 = vadd.f32 %v1911_v9, %v1910_v47  ;;  %v1932_v5 = vrot.slane %v1931_v57, 4 }
 0x283   :  { %v2207_v10 = vrot.slane %v2206_v60, 1  ;;  %v1921_v62 = vadd.f32 %v1920_v36, %v1919_v46  ;;  %v1734_v25 = vsub.f32 %v3966_v20, %v1624_v11  ;;  %v1632_v37 = vsel %vm60_vm0, %v3976_v54, -inf }
 0x284   :  { %3069 = vrcp.f32 %v1902_v53  ;;  %v1913_v15 = vrot.slane %v1912_v33, 2  ;;  %v1933_v3 = vadd.f32 %v1932_v5, %v1931_v57  ;;  %v1643_v59 = vmax.f32 %v1641_v61, %v1642_v23 }
 0x285   :  { %v4135_v21 = vadd.f32 %v2207_v10, %v2206_v60  ;;  %v1922_v12 = vrot.slane %v1921_v62, 1  ;;  %v1784_v51 = vmul.f32 1.442695, %v1734_v25  ;;  %v1633_v8 = vrot.slane %v1632_v37, 4 }
 0x286   :  { %v1914_v56 = vadd.f32 %v1913_v15, %v1912_v33  ;;  %v1934_v32 = vrot.slane %v1933_v3, 2  ;;  %v1653_v26 = vsel %vm60_vm0, %v3985_v19, -inf  ;;  %v1644_v45 = vrot.slane %v1643_v59, 1 }
 0x287   :  { %v4139_v27 = vpop.eup %3063  ;;  %v1923_v20 = vadd.f32 %v1922_v12, %v1921_v62  ;;  %3071 = vpow2.f32 %v1784_v51  ;;  %v1654_v46 = vrot.slane %v1653_v26, 4  ;;  %v1634_v9 = vmax.f32 %v1632_v37, %v1633_v8 }
 0x288   :  { %v1915_v47 = vrot.slane %v1914_v56, 1  ;;  %v1935_v58 = vadd.f32 %v1934_v32, %v1933_v3  ;;  %v1924_v55 = vsel %vm60_vm0, %v4139_v27, 0.0  ;;  %v1645_v36 = vmax.f32 %v1643_v59, %v1644_v45 }
 0x289   :  { %v4143_v11 = vpop.eup %3065  ;;  %3073 = vrcp.f32 %v1923_v20  ;;  %v1925_v60 = vrot.slane %v1924_v55, 4  ;;  %v1655_v57 = vmax.f32 %v1653_v26, %v1654_v46  ;;  %v1635_v5 = vrot.slane %v1634_v9, 2  ;;  %v4514_v46 = vld [vmem:[#allocation5_spill] sm:$0xff] }
 0x28a   :  { %v1916_v61 = vadd.f32 %v1915_v47, %v1914_v56  ;;  %v1936_v53 = vrot.slane %v1935_v58, 1  ;;  %v1945_v33 = vsel %vm60_vm0, %v4143_v11, 0.0  ;;  %v1737_v25 = vsub.f32 %v3972_v44, %v1645_v36 }
 0x28b   :  { %v1926_v10 = vadd.f32 %v1925_v60, %v1924_v55  ;;  %v1946_v62 = vrot.slane %v1945_v33, 4  ;;  %v1656_v23 = vrot.slane %v1655_v57, 2  ;;  %v1636_v37 = vmax.f32 %v1634_v9, %v1635_v5 }
 0x28c   :  { %v3068_v15 = vpop.eup %3067  ;;  %3075 = vrcp.f32 %v1916_v61  ;;  %v1937_v3 = vadd.f32 %v1936_v53, %v1935_v58  ;;  %v1646_v12 = vsel %vm60_vm0, %v3989_v38, -inf  ;;  %v1790_v32 = vmul.f32 1.442695, %v1737_v25  ;;  %v4515_v53 = vld [vmem:[#allocation6_spill] sm:$0xff] }
 0x28d   :  { %v2081_v51 = vmul.f32 %v3068_v15, %v4100_v13  ;;  %v1927_v59 = vrot.slane %v1926_v10, 2  ;;  %v1947_v56 = vadd.f32 %v1946_v62, %v1945_v33  ;;  %v1637_v26 = vrot.slane %v1636_v37, 1 }
 0x28e   :  { %v3070_v8 = vpop.eup %3069  ;;  %3077 = vrcp.f32 %v1937_v3  ;;  %v1657_v20 = vmax.f32 %v1655_v57, %v1656_v23  ;;  %v1647_v45 = vrot.slane %v1646_v12, 4 }
 0x28f   :  { %v2113_v44 = vmul.f32 %v4514_v46, %v2081_v51  ;;  %v2080_v47 = vmul.f32 %v3070_v8, %v4104_v17  ;;  %v1928_v55 = vadd.f32 %v1927_v59, %v1926_v10  ;;  %v1948_v58 = vrot.slane %v1947_v56, 2 }
 0x290   :  { %3079 = vpow2.f32 %v1790_v32  ;;  %v1638_v9 = vmax.f32 %v1636_v37, %v1637_v26  ;;  %v1658_v60 = vrot.slane %v1657_v20, 1  ;;  %v1648_v36 = vmax.f32 %v1646_v12, %v1647_v45 }
 0x291   :  { %v4153_v61 = vpop.eup %3071  ;;  %v2223_v13 = vsel %vm60_vm0, %v2113_v44, 0.0  ;;  %v2112_v33 = vmul.f32 %v2080_v47, %v4515_v53  ;;  %v1929_v5 = vrot.slane %v1928_v55, 1  ;;  %v1949_v62 = vadd.f32 %v1948_v58, %v1947_v56  ;;  %v4516_v44 = vld [vmem:[#allocation7_spill] sm:$0xff] }
 0x292   :  { %v2224_v57 = vrot.slane %v2223_v13, 4  ;;  %v1938_v25 = vsel %vm60_vm0, %v4153_v61, 0.0  ;;  %v1736_v17 = vsub.f32 %v3976_v54, %v1638_v9  ;;  %v1659_v10 = vmax.f32 %v1657_v20, %v1658_v60 }
 0x293   :  { %v3074_v23 = vpop.eup %3073  ;;  %v2216_v15 = vsel %vm60_vm0, %v2112_v33, 0.0  ;;  %v1930_v3 = vadd.f32 %v1929_v5, %v1928_v55  ;;  %v1950_v37 = vrot.slane %v1949_v62, 1  ;;  %v1939_v12 = vrot.slane %v1938_v25, 4  ;;  %v4517_v5 = vld [vmem:[#allocation8_spill] sm:$0xff] }
 0x294   :  { %v4161_v51 = vadd.f32 %v2224_v57, %v2223_v13  ;;  %v2217_v59 = vrot.slane %v2216_v15, 4  ;;  %v2083_v32 = vmul.f32 %v3074_v23, %v4118_v39  ;;  %v1788_v8 = vmul.f32 1.442695, %v1736_v17 }
 0x295   :  { %3081 = vrcp.f32 %v1930_v3  ;;  %v1951_v56 = vadd.f32 %v1950_v37, %v1949_v62  ;;  %v1940_v26 = vadd.f32 %v1939_v12, %v1938_v25  ;;  %v1739_v45 = vsub.f32 %v3985_v19, %v1659_v10  ;;  %v4518_v3 = vld [vmem:[#allocation9_spill] sm:$0xff] }
 0x296   :  { %v3076_v46 = vpop.eup %3075  ;;  %v2218_v20 = vadd.f32 %v2217_v59, %v2216_v15  ;;  %v2115_v47 = vmul.f32 %v4516_v44, %v2083_v32  ;;  %3083 = vpow2.f32 %v1788_v8  ;;  %v1649_v53 = vrot.slane %v1648_v36, 2 }
 0x297   :  { %v2082_v55 = vmul.f32 %v3076_v46, %v4124_v50  ;;  %3085 = vrcp.f32 %v1951_v56  ;;  %v1941_v58 = vrot.slane %v1940_v26, 2  ;;  %v1794_v9 = vmul.f32 1.442695, %v1739_v45 }
 0x298   :  { %v3078_v60 = vpop.eup %3077  ;;  %v2219_v39 = vrot.slane %v2218_v20, 2  ;;  %v4169_v13 = vsel %vm60_vm0, %v2115_v47, 0.0  ;;  %v1667_v19 = vsel %vm60_vm0, %v3994_v28, -inf  ;;  %v1650_v10 = vmax.f32 %v1648_v36, %v1649_v53 }
 0x299   :  { %v2114_v62 = vmul.f32 %v2082_v55, %v4517_v5  ;;  %v2085_v57 = vmul.f32 %v3078_v60, %v4128_v52  ;;  %v1942_v25 = vadd.f32 %v1941_v58, %v1940_v26  ;;  %3087 = vpow2.f32 %v1794_v9 }
 0x29a   :  { %v4176_v50 = vpop.eup %3079  ;;  %v4178_v17 = vadd.f32 %v2219_v39, %v2218_v20  ;;  %v1668_v23 = vrot.slane %v1667_v19, 4  ;;  %v1651_v56 = vrot.slane %v1650_v10, 1  ;;  %v1660_v46 = vsel %vm60_vm0, %v4002_v49, -inf }
 0x29b   :  { %v2230_v15 = vsel %vm60_vm0, %v2114_v62, 0.0  ;;  %v2117_v37 = vmul.f32 %v4518_v3, %v2085_v57  ;;  %v1943_v12 = vrot.slane %v1942_v25, 1  ;;  %v1959_v59 = vsel %vm60_vm0, %v4176_v50, 0.0 }
 0x29c   :  { %v2231_v32 = vrot.slane %v2230_v15, 4  ;;  %v1960_v8 = vrot.slane %v1959_v59, 4  ;;  %v1669_v52 = vmax.f32 %v1667_v19, %v1668_v23  ;;  %v1681_v36 = vsel %vm60_vm0, %v4008_v0, -inf }
 0x29d   :  { %v2251_v26 = vsel %vm60_vm0, %v2117_v37, 0.0  ;;  %v1944_v45 = vadd.f32 %v1943_v12, %v1942_v25  ;;  %v1652_v55 = vmax.f32 %v1650_v10, %v1651_v56  ;;  %v1661_v60 = vrot.slane %v1660_v46, 4  ;;  %v4519_v12 = vld [vmem:[#allocation10_spill] sm:$0xff] }
 0x29e   :  { %v4189_v20 = vadd.f32 %v2231_v32, %v2230_v15  ;;  %v2252_v44 = vrot.slane %v2251_v26, 4  ;;  %v1961_v47 = vadd.f32 %v1960_v8, %v1959_v59  ;;  %v1670_v9 = vrot.slane %v1669_v52, 2 }
 0x29f   :  { %v3082_v58 = vpop.eup %3081  ;;  %3089 = vrcp.f32 %v1944_v45  ;;  %v1682_v39 = vrot.slane %v1681_v36, 4  ;;  %v1738_v57 = vsub.f32 %v3989_v38, %v1652_v55  ;;  %v1662_v3 = vmax.f32 %v1660_v46, %v1661_v60 }
 0x2a0   :  { %v4191_v53 = vpop.eup %3083  ;;  %v2253_v19 = vadd.f32 %v2252_v44, %v2251_v26  ;;  %v2084_v5 = vmul.f32 %v3082_v58, %v4139_v27  ;;  %v1962_v62 = vrot.slane %v1961_v47, 2  ;;  %v1671_v15 = vmax.f32 %v1669_v52, %v1670_v9  ;;  %v4520_v58 = vld [vmem:[#allocation11_spill] sm:$0xff] }
 0x2a1   :  { %v3086_v25 = vpop.eup %3085  ;;  %v1952_v23 = vsel %vm60_vm0, %v4191_v53, 0.0  ;;  %v1683_v10 = vmax.f32 %v1681_v36, %v1682_v39  ;;  %v1792_v26 = vmul.f32 1.442695, %v1738_v57  ;;  %v1663_v27 = vrot.slane %v1662_v3, 2 }
 0x2a2   :  { %v2254_v37 = vrot.slane %v2253_v19, 2  ;;  %v2116_v59 = vmul.f32 %v2084_v5, %v4519_v12  ;;  %v2087_v32 = vmul.f32 %v3086_v25, %v4143_v11  ;;  %v1963_v8 = vadd.f32 %v1962_v62, %v1961_v47 }
 0x2a3   :  { %v1953_v56 = vrot.slane %v1952_v23, 4  ;;  %v1672_v45 = vrot.slane %v1671_v15, 1  ;;  %v4199_v44 = vpop.eup %3087  ;;  %3091 = vpow2.f32 %v1792_v26  ;;  %v1664_v12 = vmax.f32 %v1662_v3, %v1663_v27  ;;  %v4521_v3 = vld [vmem:[#allocation12_spill] sm:$0xff] }
 0x2a4   :  { %v4201_v38 = vadd.f32 %v2254_v37, %v2253_v19  ;;  %v2244_v55 = vsel %vm60_vm0, %v2116_v59, 0.0  ;;  %v2119_v52 = vmul.f32 %v4520_v58, %v2087_v32  ;;  %v1964_v46 = vrot.slane %v1963_v8, 1 }
 0x2a5   :  { %v2245_v36 = vrot.slane %v2244_v55, 4  ;;  %v1954_v9 = vadd.f32 %v1953_v56, %v1952_v23  ;;  %v1973_v60 = vsel %vm60_vm0, %v4199_v44, 0.0  ;;  %v1673_v25 = vmax.f32 %v1671_v15, %v1672_v45 }
 0x2a6   :  { %v2265_v47 = vsel %vm60_vm0, %v2119_v52, 0.0  ;;  %v1965_v39 = vadd.f32 %v1964_v46, %v1963_v8  ;;  %v1974_v5 = vrot.slane %v1973_v60, 4  ;;  %v1684_v59 = vrot.slane %v1683_v10, 2 }
 0x2a7   :  { %v2246_v62 = vadd.f32 %v2245_v36, %v2244_v55  ;;  %v2266_v19 = vrot.slane %v2265_v47, 4  ;;  %v1955_v57 = vrot.slane %v1954_v9, 2  ;;  %v1741_v26 = vsub.f32 %v3994_v28, %v1673_v25 }
 0x2a8   :  { %3093 = vrcp.f32 %v1965_v39  ;;  %v1975_v37 = vadd.f32 %v1974_v5, %v1973_v60  ;;  %v1665_v8 = vrot.slane %v1664_v12, 1  ;;  %v1685_v46 = vmax.f32 %v1683_v10, %v1684_v59 }
 0x2a9   :  { %v3090_v32 = vpop.eup %3089  ;;  %v2247_v23 = vrot.slane %v2246_v62, 2  ;;  %v4209_v56 = vadd.f32 %v2266_v19, %v2265_v47  ;;  %v1956_v58 = vadd.f32 %v1955_v57, %v1954_v9  ;;  %v1798_v36 = vmul.f32 1.442695, %v1741_v26  ;;  %v4524_v9 = vld [vmem:[#allocation14_spill] sm:$0xff] }
 0x2aa   :  { %v2086_v11 = vmul.f32 %v3090_v32, %v4153_v61  ;;  %v1976_v52 = vrot.slane %v1975_v37, 2  ;;  %v1666_v39 = vmax.f32 %v1664_v12, %v1665_v8  ;;  %v1686_v47 = vrot.slane %v1685_v46, 1 }
 0x2ab   :  { %v4213_v55 = vadd.f32 %v2247_v23, %v2246_v62  ;;  %v1957_v45 = vrot.slane %v1956_v58, 1  ;;  %3095 = vpow2.f32 %v1798_v36  ;;  %v1674_v28 = vsel %vm60_vm0, %v4013_v6, -inf }
 0x2ac   :  { %v2118_v27 = vmul.f32 %v2086_v11, %v4521_v3  ;;  %v1977_v60 = vadd.f32 %v1976_v52, %v1975_v37  ;;  %v1740_v62 = vsub.f32 %v4002_v49, %v1666_v39  ;;  %v1687_v19 = vmax.f32 %v1685_v46, %v1686_v47 }
 0x2ad   :  { %v1958_v5 = vadd.f32 %v1957_v45, %v1956_v58  ;;  %v4222_v57 = vpop.eup %3091  ;;  %v1675_v11 = vrot.slane %v1674_v28, 4  ;;  %v1695_v37 = vsel %vm60_vm0, %v4021_v34, -inf  ;;  %v1688_v45 = vsel %vm60_vm0, %v4026_v48, -inf }
 0x2ae   :  { %v2258_v61 = vsel %vm60_vm0, %v2118_v27, 0.0  ;;  %v1978_v10 = vrot.slane %v1977_v60, 1  ;;  %v1966_v59 = vsel %vm60_vm0, %v4222_v57, 0.0  ;;  %v1796_v32 = vmul.f32 1.442695, %v1740_v62 }
 0x2af   :  { %v2259_v25 = vrot.slane %v2258_v61, 4  ;;  %3097 = vrcp.f32 %v1958_v5  ;;  %v1743_v23 = vsub.f32 %v4008_v0, %v1687_v19  ;;  %v1967_v26 = vrot.slane %v1966_v59, 4 }
 0x2b0   :  { %v1979_v12 = vadd.f32 %v1978_v10, %v1977_v60  ;;  %v1676_v52 = vmax.f32 %v1674_v28, %v1675_v11  ;;  %v1696_v49 = vrot.slane %v1695_v37, 4  ;;  %v1709_v36 = vsel %vm60_vm0, %v4033_v16, -inf  ;;  %v4522_v28 = vld [vmem:[#allocation13_spill] sm:$0xff] }
 0x2b1   :  { %v2260_v58 = vadd.f32 %v2259_v25, %v2258_v61  ;;  %v1802_v46 = vmul.f32 1.442695, %v1743_v23  ;;  %v1968_v60 = vadd.f32 %v1967_v26, %v1966_v59  ;;  %v1689_v47 = vrot.slane %v1688_v45, 4 }
 0x2b2   :  { %v3094_v8 = vpop.eup %3093  ;;  %3099 = vrcp.f32 %v1979_v12  ;;  %v1677_v0 = vrot.slane %v1676_v52, 2  ;;  %v1697_v39 = vmax.f32 %v1695_v37, %v1696_v49  ;;  %v1710_v62 = vrot.slane %v1709_v36, 4  ;;  %v4523_v37 = vld [vmem:[#allocation30_spill] sm:$0xff] }
 0x2b3   :  { %v2261_v3 = vrot.slane %v2260_v58, 2  ;;  %v2089_v27 = vmul.f32 %v3094_v8, %v4176_v50  ;;  %3101 = vpow2.f32 %v1796_v32  ;;  %v1969_v10 = vrot.slane %v1968_v60, 2 }
 0x2b4   :  { %3103 = vpow2.f32 %v1802_v46  ;;  %v1678_v19 = vmax.f32 %v1676_v52, %v1677_v0  ;;  %v1698_v25 = vrot.slane %v1697_v39, 2  ;;  %v1690_v11 = vmax.f32 %v1688_v45, %v1689_v47 }
 0x2b5   :  { %v4234_v5 = vadd.f32 %v2261_v3, %v2260_v58  ;;  %v4237_v61 = vmul.f32 %v4522_v28, %v2089_v27  ;;  %v1702_v12 = vsel %vm60_vm0, %v4036_v31, -inf  ;;  %v4241_v50 = vpop.eup %3095  ;;  %v1970_v59 = vadd.f32 %v1969_v10, %v1968_v60 }
 0x2b6   :  { %v1711_v32 = vmax.f32 %v1709_v36, %v1710_v62  ;;  %v1703_v23 = vrot.slane %v1702_v12, 4  ;;  %v4245_v58 = vmul.f32 %v4523_v37, %v4055_v40  ;;  %v1987_v26 = vsel %vm60_vm0, %v4241_v50, 0.0 }
 0x2b7   :  { %v1679_v49 = vrot.slane %v1678_v19, 1  ;;  %v1699_v8 = vmax.f32 %v1697_v39, %v1698_v25  ;;  %v1691_v52 = vrot.slane %v1690_v11, 2  ;;  %v1971_v45 = vrot.slane %v1970_v59, 1 }
 0x2b8   :  { %v1988_v3 = vrot.slane %v1987_v26, 4  ;;  %v1712_v27 = vrot.slane %v1711_v32, 2  ;;  %v1704_v0 = vmax.f32 %v1702_v12, %v1703_v23 }
 0x2b9   :  { %v3098_v46 = vpop.eup %3097  ;;  %v1680_v60 = vmax.f32 %v1678_v19, %v1679_v49  ;;  %v1700_v36 = vrot.slane %v1699_v8, 1  ;;  %v1692_v28 = vmax.f32 %v1690_v11, %v1691_v52  ;;  %v1972_v10 = vadd.f32 %v1971_v45, %v1970_v59 }
 0x2ba   :  { %v2088_v47 = vmul.f32 %v3098_v46, %v4191_v53  ;;  %v1989_v62 = vadd.f32 %v1988_v3, %v1987_v26  ;;  %v1713_v40 = vmax.f32 %v1711_v32, %v1712_v27  ;;  %v1705_v37 = vrot.slane %v1704_v0, 2 }
 0x2bb   :  { %v1742_v39 = vsub.f32 %v4013_v6, %v1680_v60  ;;  %v1701_v25 = vmax.f32 %v1699_v8, %v1700_v36  ;;  %v1693_v54 = vrot.slane %v1692_v28, 1  ;;  %3105 = vrcp.f32 %v1972_v10 }
 0x2bc   :  { %v3100_v15 = vpop.eup %3099  ;;  %v2120_v33 = vmul.f32 %v2088_v47, %v4524_v9  ;;  %v1990_v53 = vrot.slane %v1989_v62, 2  ;;  %v1714_v19 = vrot.slane %v1713_v40, 1  ;;  %v1706_v3 = vmax.f32 %v1704_v0, %v1705_v37 }
 0x2bd   :  { %v4252_v4 = vpop.eup %3101  ;;  %v4255_v12 = vmul.f32 %v3100_v15, %v4199_v44  ;;  %v1800_v32 = vmul.f32 1.442695, %v1742_v39  ;;  %v1745_v6 = vsub.f32 %v4021_v34, %v1701_v25  ;;  %v1694_v52 = vmax.f32 %v1692_v28, %v1693_v54 }
 0x2be   :  { %v4257_v11 = vpop.eup %3103  ;;  %v4260_v59 = vsel %vm60_vm0, %v2120_v33, 0.0  ;;  %v1980_v9 = vsel %vm60_vm0, %v4252_v4, 0.0  ;;  %v1991_v26 = vadd.f32 %v1990_v53, %v1989_v62  ;;  %v1715_v45 = vmax.f32 %v1713_v40, %v1714_v19 }
 0x2bf   :  { %v2273_v23 = vrot.slane %v4260_v59, 4  ;;  %v1981_v49 = vrot.slane %v1980_v9, 4  ;;  %v2001_v44 = vsel %vm60_vm0, %v4257_v11, 0.0  ;;  %3107 = vpow2.f32 %v1800_v32 }
 0x2c0   :  { %v2002_v15 = vrot.slane %v2001_v44, 4  ;;  %v1806_v8 = vmul.f32 1.442695, %v1745_v6  ;;  %v1992_v46 = vrot.slane %v1991_v26, 1  ;;  %v1744_v47 = vsub.f32 %v4026_v48, %v1694_v52 }
 0x2c1   :  { %v1982_v33 = vadd.f32 %v1981_v49, %v1980_v9  ;;  %v2138_v34 = vadd.f32 %v2137_v14, %v4045_v35  ;;  %v1747_v10 = vsub.f32 %v4033_v16, %v1715_v45  ;;  %v1707_v62 = vrot.slane %v1706_v3, 1 }
 0x2c2   :  { %v2003_v27 = vadd.f32 %v2002_v15, %v2001_v44  ;;  %3109 = vpow2.f32 %v1806_v8  ;;  %v1993_v60 = vadd.f32 %v1992_v46, %v1991_v26  ;;  %v1804_v25 = vmul.f32 1.442695, %v1744_v47  ;;  %v4525_v44 = vld [vmem:[#allocation16_spill] sm:$0xff] }
 0x2c3   :  { %v1983_v36 = vrot.slane %v1982_v33, 2  ;;  %v2145_v54 = vadd.f32 %v2144_v30, %v4040_v29  ;;  %v2151_v0 = vrot.slane %v4064_v7, 1  ;;  %v1810_v48 = vmul.f32 1.442695, %v1747_v10 }
 0x2c4   :  { %v2004_v39 = vrot.slane %v2003_v27, 2  ;;  %3111 = vrcp.f32 %v1993_v60  ;;  %v1708_v40 = vmax.f32 %v1706_v3, %v1707_v62  ;;  %v2157_v16 = vadd.f32 %v2156_v2, %v4042_v43  ;;  %v2356_v3 = vld [vmem:[%s4465_s4] sm:$0xff] }
 0x2c5   :  { %v1984_v28 = vadd.f32 %v1983_v36, %v1982_v33  ;;  %3113 = vpow2.f32 %v1804_v25  ;;  %v2152_v35 = vadd.f32 %v2151_v0, %v4064_v7  ;;  %v3106_v14 = vpop.eup %3105  ;;  %v2162_v29 = vadd.f32 %v2161_v42, %v4058_v24 }
 0x2c6   :  { %v2005_v37 = vadd.f32 %v2004_v39, %v2003_v27  ;;  %3115 = vpow2.f32 %v1810_v48  ;;  %v1746_v19 = vsub.f32 %v4036_v31, %v1708_v40  ;;  %v2090_v30 = vmul.f32 %v3106_v14, %v4222_v57 }
 0x2c7   :  { %v1985_v53 = vrot.slane %v1984_v28, 1  ;;  %v2158_v32 = vrot.slane %v2157_v16, 1  ;;  %v2167_v7 = vsel %vm60_vm0, %v4048_v41, 0.0  ;;  %v2163_v49 = vrot.slane %v2162_v29, 2 }
 0x2c8   :  { %v2006_v9 = vrot.slane %v2005_v37, 1  ;;  %v1808_v26 = vmul.f32 1.442695, %v1746_v19  ;;  %v2168_v43 = vrot.slane %v2167_v7, 4  ;;  %v4291_v15 = vmul.f32 %v2090_v30, %v4525_v44 }
 0x2c9   :  { %v1986_v6 = vadd.f32 %v1985_v53, %v1984_v28  ;;  %v4288_v2 = vpop.eup %3107  ;;  %v4293_v8 = vadd.f32 %v2158_v32, %v2157_v16  ;;  %v2174_v24 = vsel %vm60_vm0, %v4074_v22, 0.0  ;;  %v2164_v41 = vadd.f32 %v2163_v49, %v2162_v29  ;;  %v2357_v22 = vld [vmem:[%s4465_s4 + $0x8] sm:$0xff] }
 0x2ca   :  { %v2007_v31 = vadd.f32 %v2006_v9, %v2005_v37  ;;  %v1994_v42 = vsel %vm60_vm0, %v4288_v2, 0.0  ;;  %v2169_v57 = vadd.f32 %v2168_v43, %v2167_v7  ;;  %v2175_v33 = vrot.slane %v2174_v24, 4  ;;  %v4526_v7 = vld [vmem:[#allocation17_spill] sm:$0xff] }
 0x2cb   :  { %3117 = vrcp.f32 %v1986_v6  ;;  %v1995_v46 = vrot.slane %v1994_v42, 4  ;;  %v2181_v45 = vsel %vm60_vm0, %v4245_v58, 0.0  ;;  %v2165_v47 = vrot.slane %v2164_v41, 1 }
 0x2cc   :  { %v4299_v52 = vpop.eup %3109  ;;  %3119 = vrcp.f32 %v2007_v31  ;;  %v2170_v60 = vrot.slane %v2169_v57, 2  ;;  %v2176_v62 = vadd.f32 %v2175_v33, %v2174_v24  ;;  %v2182_v39 = vrot.slane %v2181_v45, 4 }
 0x2cd   :  { %v2015_v27 = vsel %vm60_vm0, %v4299_v52, 0.0  ;;  %3121 = vpow2.f32 %v1808_v26  ;;  %v1996_v36 = vadd.f32 %v1995_v46, %v1994_v42  ;;  %v4311_v58 = vadd.f32 %v2165_v47, %v2164_v41 }
 0x2ce   :  { %v2016_v10 = vrot.slane %v2015_v27, 4  ;;  %v3112_v25 = vpop.eup %3111  ;;  %v2171_v0 = vadd.f32 %v2170_v60, %v2169_v57  ;;  %v2392_v28 = vsel %vm616_vm1, %v2145_v54, %v2138_v34  ;;  %v2989_v48 = vpack.c.bf16 %v2357_v22, %v2356_v3 }
 0x2cf   :  { %v4314_v40 = vpop.eup %3113  ;;  %v2093_v37 = vmul.f32 %v3112_v25, %v4241_v50  ;;  %v1997_v16 = vrot.slane %v1996_v36, 2  ;;  %v2177_v53 = vrot.slane %v2176_v62, 2  ;;  %v2183_v9 = vadd.f32 %v2182_v39, %v2181_v45 }
 0x2d0   :  { %v2017_v14 = vadd.f32 %v2016_v10, %v2015_v27  ;;  %v4317_v19 = vpop.eup %3115  ;;  %v2008_v29 = vsel %vm60_vm0, %v4314_v40, 0.0  ;;  %v2172_v30 = vrot.slane %v2171_v0, 1  ;;  %v2393_v32 = vsel %vm619_vm2, %v2152_v35, %v2392_v28  ;;  %2990 = vmatprep.subr.bf16.mxu0 %v2989_v48 }
 0x2d1   :  { %v2125_v34 = vmul.f32 %v4526_v7, %v2093_v37  ;;  %v1998_v54 = vadd.f32 %v1997_v16, %v1996_v36  ;;  %v2009_v26 = vrot.slane %v2008_v29, 4  ;;  %2992 = vmatpush3.bf16.msra.mxu0 %v2989_v48  ;;  %v2029_v50 = vsel %vm60_vm0, %v4317_v19, 0.0 }
 0x2d2   :  { %v2018_v6 = vrot.slane %v2017_v14, 2  ;;  %v2173_v49 = vadd.f32 %v2172_v30, %v2171_v0  ;;  %v2178_v43 = vadd.f32 %v2177_v53, %v2176_v62  ;;  %v2184_v44 = vrot.slane %v2183_v9, 2  ;;  %v4527_v0 = vld [vmem:[#allocation18_spill] sm:$0xff] }
 0x2d3   :  { %v2307_v31 = vsel %vm60_vm0, %v2125_v34, 0.0  ;;  %v1999_v24 = vrot.slane %v1998_v54, 1  ;;  %v2010_v41 = vadd.f32 %v2009_v26, %v2008_v29  ;;  %v2030_v46 = vrot.slane %v2029_v50, 4 }
 0x2d4   :  { %v2019_v42 = vadd.f32 %v2018_v6, %v2017_v14  ;;  %v2308_v35 = vrot.slane %v2307_v31, 4  ;;  %v2179_v33 = vrot.slane %v2178_v43, 1  ;;  %v2185_v45 = vadd.f32 %v2184_v44, %v2183_v9  ;;  %v4528_v14 = vld [vmem:[#allocation19_spill] sm:$0xff] }
 0x2d5   :  { %v3118_v57 = vpop.eup %3117  ;;  %v2000_v27 = vadd.f32 %v1999_v24, %v1998_v54  ;;  %v2011_v60 = vrot.slane %v2010_v41, 2  ;;  %v2031_v39 = vadd.f32 %v2030_v46, %v2029_v50  ;;  %v2359_v24 = vld [vmem:[%s4465_s4 + $0x18] sm:$0xff] }
 0x2d6   :  { %v3120_v3 = vpop.eup %3119  ;;  %v2092_v22 = vmul.f32 %v3118_v57, %v4252_v4  ;;  %v2020_v47 = vrot.slane %v2019_v42, 1  ;;  %v2309_v10 = vadd.f32 %v2308_v35, %v2307_v31  ;;  %v2180_v25 = vadd.f32 %v2179_v33, %v2178_v43  ;;  %v2358_v31 = vld [vmem:[%s4465_s4 + $0x10] sm:$0xff]  ;;  %s3158_s4 = smov [#allocation2]  }
 0x2d7   :  { %v4327_v36 = vpop.eup %3121  ;;  %v2095_v62 = vmul.f32 %v3120_v3, %v4257_v11  ;;  %3123 = vrcp.f32 %v2000_v27  ;;  %v2012_v37 = vadd.f32 %v2011_v60, %v2010_v41  ;;  %v2032_v29 = vrot.slane %v2031_v39, 2  ;;  %s2522_s19 = sshll.u32 %s3158_s4, 4  ;;  %s2523_s19 = int_to_ptr.vmem [resolvable:$true] %s2522_s19 }
 0x2d8   :  { %v2124_v28 = vmul.f32 %v2092_v22, %v4527_v0  ;;  %v2021_v48 = vadd.f32 %v2020_v47, %v2019_v42  ;;  %v2310_v16 = vrot.slane %v2309_v10, 2  ;;  %v2022_v4 = vsel %vm60_vm0, %v4327_v36, 0.0  ;;  %s3133_s20 = scalar_lea.vmem %s2523_s19, 512  ;;  %p3138_p1 = scmp.lt.s32.totalorder %s2523_s19, %s2523_s19 }
 0x2d9   :  { %v2127_v53 = vmul.f32 %v4528_v14, %v2095_v62  ;;  %v2013_v9 = vrot.slane %v2012_v37, 1  ;;  %v2023_v7 = vrot.slane %v2022_v4, 4  ;;  %v2033_v6 = vadd.f32 %v2032_v29, %v2031_v39  ;;  %p3134_p0 = scmp.ne.s32.totalorder %s2523_s19, %s3133_s20  ;;  %p3139_p2 = scmp.lt.s32.totalorder %s3133_s20, %s3133_s20 }
 0x2da   :  { %v2300_v30 = vsel %vm60_vm0, %v2124_v28, 0.0  ;;  %3125 = vrcp.f32 %v2021_v48  ;;  %v4335_v11 = vadd.f32 %v2310_v16, %v2309_v10  ;;  %v2186_v44 = vrot.slane %v2185_v45, 1 }
 0x2db   :  { %v2301_v34 = vrot.slane %v2300_v30, 4  ;;  %v2321_v54 = vsel %vm60_vm0, %v2127_v53, 0.0  ;;  %v2014_v50 = vadd.f32 %v2013_v9, %v2012_v37  ;;  %v2024_v43 = vadd.f32 %v2023_v7, %v2022_v4  ;;  %p3140_p3 = por %p3139_p2, %p3138_p1 }
 0x2dc   :  { %v2322_v26 = vrot.slane %v2321_v54, 4  ;;  %v2312_v42 = vrot.slane %v4335_v11, 1  ;;  %v2034_v57 = vrot.slane %v2033_v6, 1  ;;  %v2394_v35 = vsel %vm622_vm3, %v4293_v8, %v2393_v32 }
 0x2dd   :  { %v2302_v41 = vadd.f32 %v2301_v34, %v2300_v30  ;;  %3127 = vrcp.f32 %v2014_v50  ;;  %v2025_v33 = vrot.slane %v2024_v43, 2  ;;  %v2187_v3 = vadd.f32 %v2186_v44, %v2185_v45  ;;  %p3141_p4 = pnand %p3140_p3, %p3134_p0 }
 0x2de   :  { %v4347_v46 = vadd.f32 %v2322_v26, %v2321_v54  ;;  %v2035_v27 = vadd.f32 %v2034_v57, %v2033_v6  ;;  %v2395_v47 = vsel %vm625_vm4, %v4311_v58, %v2394_v35  ;;  %v2993_v60 = vpack.c.bf16 %v2359_v24, %v2358_v31  ;;  %v4532_v54 = vld [vmem:[#allocation20_spill] sm:$0xff] }
 0x2df   :  { %v2303_v22 = vrot.slane %v2302_v41, 2  ;;  %v2026_v62 = vadd.f32 %v2025_v33, %v2024_v43  ;;  %v2396_v39 = vsel %vm628_vm5, %v2173_v49, %v2395_v47  ;;  %v4529_v0 = vrot.slane %v4112_v63, 1 }
 0x2e0   :  { %v2324_v10 = vrot.slane %v4347_v46, 2  ;;  %3129 = vrcp.f32 %v2035_v27  ;;  %v2397_v45 = vsel %vm631_vm6, %v2180_v25, %v2396_v39  ;;  %2994 = vmatprep.subr.bf16.mxu0 %v2993_v60  ;;  %v2221_v28 = vrot.slane %v4178_v17, 1 }
 0x2e1   :  { %v2215_v8 = vadd.f32 %v4529_v0, %v4112_v63  ;;  %v4356_v32 = vadd.f32 %v2303_v22, %v2302_v41  ;;  %v3124_v48 = vpop.eup %3123  ;;  %v2027_v58 = vrot.slane %v2026_v62, 1  ;;  %v2398_v37 = vsel %vm634_vm7, %v2187_v3, %v2397_v45  ;;  %2996 = vmatpush3.bf16.msra.mxu0 %v2993_v60 }
 0x2e2   :  { %v4530_v49 = vrot.slane %v4161_v51, 2  ;;  %v2233_v14 = vrot.slane %v4189_v20, 2  ;;  %v2094_v53 = vmul.f32 %v3124_v48, %v4288_v2  ;;  %2951 = vmatprep.mubr.msk.f32.mxu0 %vm60_vm0, %v2398_v37  ;;  %v2222_v25 = vadd.f32 %v2221_v28, %v4178_v17 }
 0x2e3   :  { %v2305_v63 = vrot.slane %v4356_v32, 1  ;;  %v4531_v29 = vrot.slane %v4169_v13, 4  ;;  %v2028_v9 = vadd.f32 %v2027_v58, %v2026_v62  ;;  %v4535_v22 = vrot.slane %v4213_v55, 1 }
 0x2e4   :  { %v2227_v16 = vadd.f32 %v4530_v49, %v4161_v51  ;;  %v3126_v30 = vpop.eup %3125  ;;  %v2234_v34 = vadd.f32 %v2233_v14, %v4189_v20  ;;  %v2399_v51 = vsel %vm616_vm1, %v4094_v1, %v4106_v18  ;;  %v2126_v6 = vmul.f32 %v2094_v53, %v4532_v54  ;;  %v4533_v20 = vld [vmem:[#allocation21_spill] sm:$0xff] }
 0x2e5   :  { %v2239_v4 = vadd.f32 %v4531_v29, %v4169_v13  ;;  %v2097_v2 = vmul.f32 %v3126_v30, %v4299_v52  ;;  %v2400_v17 = vsel %vm619_vm2, %v4135_v21, %v2399_v51  ;;  %3131 = vrcp.f32 %v2028_v9  ;;  %v4534_v21 = vld [vmem:[#allocation15_spill] sm:$0xff] }
 0x2e6   :  { %v2228_v7 = vrot.slane %v2227_v16, 1  ;;  %v2235_v13 = vrot.slane %v2234_v34, 1  ;;  %v2401_v43 = vsel %vm622_vm3, %v2215_v8, %v2400_v17  ;;  %v2314_v44 = vsel %vm60_vm0, %v2126_v6, 0.0  ;;  %v4539_v51 = vld [vmem:[#allocation23_spill] sm:$0xff] }
 0x2e7   :  { %v2240_v26 = vrot.slane %v2239_v4, 2  ;;  %v4383_v31 = vmul.f32 %v4533_v20, %v2097_v2  ;;  %v2402_v1 = vsel %vm625_vm4, %v2222_v25, %v2401_v43  ;;  %v3128_v18 = vpop.eup %3127  ;;  %v2315_v41 = vrot.slane %v2314_v44, 4  ;;  %v4540_v20 = vld [vmem:[#allocation24_spill] sm:$0xff] }
 0x2e8   :  { %v2229_v50 = vadd.f32 %v2228_v7, %v2227_v16  ;;  %v2236_v52 = vadd.f32 %v2235_v13, %v2234_v34  ;;  %v2123_v35 = vmul.f32 %v4534_v21, %v4255_v12  ;;  %v2096_v33 = vmul.f32 %v3128_v18, %v4314_v40  ;;  %v4538_v40 = vld [vmem:[#allocation22_spill] sm:$0xff] }
 0x2e9   :  { %v2241_v24 = vadd.f32 %v2240_v26, %v2239_v4  ;;  %v2250_v27 = vadd.f32 %v4535_v22, %v4213_v55  ;;  %v4536_v47 = vrot.slane %v4201_v38, 1  ;;  %v2316_v62 = vadd.f32 %v2315_v41, %v2314_v44 }
 0x2ea   :  { %v2403_v57 = vsel %vm628_vm5, %v2229_v50, %v2402_v1  ;;  %v2263_v0 = vrot.slane %v4234_v5, 1  ;;  %v4537_v8 = vrot.slane %v4209_v56, 2  ;;  %v3130_v45 = vpop.eup %3129  ;;  %v2128_v28 = vmul.f32 %v2096_v33, %v4538_v40 }
 0x2eb   :  { %v2242_v3 = vrot.slane %v2241_v24, 1  ;;  %v2257_v60 = vadd.f32 %v4536_v47, %v4201_v38  ;;  %v2404_v39 = vsel %vm631_vm6, %v2236_v52, %v2403_v57  ;;  %v2274_v55 = vadd.f32 %v2273_v23, %v4260_v59 }
 0x2ec   :  { %v2269_v12 = vadd.f32 %v4537_v8, %v4209_v56  ;;  %v2279_v38 = vsel %vm60_vm0, %v4237_v61, 0.0  ;;  %v2317_v58 = vrot.slane %v2316_v62, 2  ;;  %v2099_v37 = vmul.f32 %v3130_v45, %v4317_v19 }
 0x2ed   :  { %v2243_v48 = vadd.f32 %v2242_v3, %v2241_v24  ;;  %v2264_v49 = vadd.f32 %v2263_v0, %v4234_v5  ;;  %v2328_v14 = vsel %vm60_vm0, %v2128_v28, 0.0  ;;  %v2275_v53 = vrot.slane %v2274_v55, 2 }
 0x2ee   :  { %v2270_v16 = vrot.slane %v2269_v12, 1  ;;  %v2280_v25 = vrot.slane %v2279_v38, 4  ;;  %v2318_v29 = vadd.f32 %v2317_v58, %v2316_v62  ;;  %v2329_v4 = vrot.slane %v2328_v14, 4 }
 0x2ef   :  { %v2405_v56 = vsel %vm634_vm7, %v2243_v48, %v2404_v39  ;;  %v2286_v61 = vsel %vm60_vm0, %v4291_v15, 0.0  ;;  %v2276_v23 = vadd.f32 %v2275_v53, %v2274_v55  ;;  %v2293_v5 = vsel %vm60_vm0, %v2123_v35, 0.0  ;;  %v3132_v9 = vpop.eup %3131 }
 0x2f0   :  { %2952 = vmatmul.mubr.msk.f32.vlgmr.msra.gmra.mrb[48].mxu0 %vm60_vm0, %v2405_v56  ;;  %v2271_v59 = vadd.f32 %v2270_v16, %v2269_v12  ;;  %v2281_v30 = vadd.f32 %v2280_v25, %v2279_v38  ;;  %v2287_v19 = vrot.slane %v2286_v61, 4  ;;  %v2294_v7 = vrot.slane %v2293_v5, 4 }
 0x2f1   :  { %v2406_v34 = vsel %vm616_vm1, %v2257_v60, %v2250_v27  ;;  %v2131_v54 = vmul.f32 %v4539_v51, %v2099_v37  ;;  %v2306_v6 = vadd.f32 %v2305_v63, %v4356_v32  ;;  %v2098_v2 = vmul.f32 %v3132_v9, %v4327_v36 }
 0x2f2   :  { %v2277_v26 = vrot.slane %v2276_v23, 1  ;;  %v2282_v17 = vrot.slane %v2281_v30, 2  ;;  %v2288_v50 = vadd.f32 %v2287_v19, %v2286_v61  ;;  %v2295_v13 = vadd.f32 %v2294_v7, %v2293_v5 }
 0x2f3   :  { %v2407_v15 = vsel %vm619_vm2, %v2264_v49, %v2406_v34  ;;  %v2313_v43 = vadd.f32 %v2312_v42, %v4335_v11  ;;  %v2319_v44 = vrot.slane %v2318_v29, 1  ;;  %v2130_v24 = vmul.f32 %v2098_v2, %v4540_v20 }
 0x2f4   :  { %v2278_v1 = vadd.f32 %v2277_v26, %v2276_v23  ;;  %v2283_v18 = vadd.f32 %v2282_v17, %v2281_v30  ;;  %v2289_v41 = vrot.slane %v2288_v50, 2  ;;  %v2296_v52 = vrot.slane %v2295_v13, 2 }
 0x2f5   :  { %v2408_v32 = vsel %vm622_vm3, %v2271_v59, %v2407_v15  ;;  %v2320_v36 = vadd.f32 %v2319_v44, %v2318_v29  ;;  %v2325_v63 = vadd.f32 %v2324_v10, %v4347_v46  ;;  %v2330_v33 = vadd.f32 %v2329_v4, %v2328_v14 }
 0x2f6   :  { %v2284_v57 = vrot.slane %v2283_v18, 1  ;;  %v2290_v21 = vadd.f32 %v2289_v41, %v2288_v50  ;;  %v2409_v35 = vsel %vm625_vm4, %v2278_v1, %v2408_v32  ;;  %v2297_v11 = vadd.f32 %v2296_v52, %v2295_v13 }
 0x2f7   :  { %v2326_v42 = vrot.slane %v2325_v63, 1  ;;  %v2335_v3 = vsel %vm60_vm0, %v4383_v31, 0.0  ;;  %v2342_v22 = vsel %vm60_vm0, %v2130_v24, 0.0  ;;  %v2331_v60 = vrot.slane %v2330_v33, 2 }
 0x2f8   :  { %v2285_v27 = vadd.f32 %v2284_v57, %v2283_v18  ;;  %v2291_v47 = vrot.slane %v2290_v21, 1  ;;  %v2336_v62 = vrot.slane %v2335_v3, 4  ;;  %v2298_v39 = vrot.slane %v2297_v11, 1 }
 0x2f9   :  { %v2327_v0 = vadd.f32 %v2326_v42, %v2325_v63  ;;  %v2343_v8 = vrot.slane %v2342_v22, 4  ;;  %v2349_v46 = vsel %vm60_vm0, %v2131_v54, 0.0  ;;  %v2332_v45 = vadd.f32 %v2331_v60, %v2330_v33 }
 0x2fa   :  { %v2292_v10 = vadd.f32 %v2291_v47, %v2290_v21  ;;  %v2410_v12 = vsel %vm628_vm5, %v2285_v27, %v2409_v35  ;;  %v2337_v40 = vadd.f32 %v2336_v62, %v2335_v3  ;;  %v2299_v28 = vadd.f32 %v2298_v39, %v2297_v11 }
 0x2fb   :  { %v2344_v48 = vadd.f32 %v2343_v8, %v2342_v22  ;;  %v2350_v55 = vrot.slane %v2349_v46, 4  ;;  %v2413_v31 = vsel %vm616_vm1, %v2313_v43, %v2306_v6  ;;  %v2333_v58 = vrot.slane %v2332_v45, 1 }
 0x2fc   :  { %v2411_v38 = vsel %vm631_vm6, %v2292_v10, %v2410_v12  ;;  %v2338_v37 = vrot.slane %v2337_v40, 2  ;;  %v2414_v49 = vsel %vm619_vm2, %v2320_v36, %v2413_v31 }
 0x2fd   :  { %v2412_v16 = vsel %vm634_vm7, %v2299_v28, %v2411_v38  ;;  %v2345_v14 = vrot.slane %v2344_v48, 2  ;;  %v2351_v56 = vadd.f32 %v2350_v55, %v2349_v46  ;;  %v2415_v53 = vsel %vm622_vm3, %v2327_v0, %v2414_v49 }
 0x2fe   :  { %2954 = vmatprep.mubr.msk.f32.mxu0 %vm60_vm0, %v2412_v16  ;;  %v2334_v25 = vadd.f32 %v2333_v58, %v2332_v45  ;;  %v2339_v29 = vadd.f32 %v2338_v37, %v2337_v40 }
 0x2ff   :  { %v2346_v4 = vadd.f32 %v2345_v14, %v2344_v48  ;;  %v2352_v59 = vrot.slane %v2351_v56, 2 }
 0x300   :  { %v2340_v61 = vrot.slane %v2339_v29, 1  ;;  %v2416_v23 = vsel %vm625_vm4, %v2334_v25, %v2415_v53 }
 0x301   :  { %v2347_v30 = vrot.slane %v2346_v4, 1  ;;  %v2353_v19 = vadd.f32 %v2352_v59, %v2351_v56 }
 0x302   :  { %v2341_v5 = vadd.f32 %v2340_v61, %v2339_v29 }
 0x303   :  { %v2348_v9 = vadd.f32 %v2347_v30, %v2346_v4  ;;  %v2354_v7 = vrot.slane %v2353_v19, 1 }
 0x304   :  { %v2417_v34 = vsel %vm628_vm5, %v2341_v5, %v2416_v23 }
 0x305   :  { %v2355_v51 = vadd.f32 %v2354_v7, %v2353_v19  ;;  %v2418_v54 = vsel %vm631_vm6, %v2348_v9, %v2417_v34 }
 0x307   :  { %v2419_v6 = vsel %vm634_vm7, %v2355_v51, %v2418_v54 }
 0x308   :  { %2955 = vmatmul.mubr.msk.f32.gmra.mrb[50].mxu0 %vm60_vm0, %v2419_v6 }
 0x3c3   :  { %v2953_v2 = vpop.f32.mrb[48].mxu0 }
 0x3c4   :  { %2514 = vst.msk [vmem:[#allocation2 + $0x8] sm:$0xff] %vm60_vm0, %v2953_v2  ;;  %v2494_v26 = vpop.f32.mrb[49].mxu0 }
 0x3c5   :  { %2513 = vst.msk [vmem:[#allocation2] sm:$0xff] %vm60_vm0, %v2494_v26 }
 0x3db   :  { %v2956_v17 = vpop.f32.mrb[50].mxu0 }
 0x3dc   :  { %2516 = vst.msk [vmem:[#allocation2 + $0x18] sm:$0xff] %vm60_vm0, %v2956_v17  ;;  %v2504_v50 = vpop.f32.mrb[51].mxu0 }
 0x3dd   :  { %2515 = vst.msk [vmem:[#allocation2 + $0x10] sm:$0xff] %vm60_vm0, %v2504_v50 }
 0x3de   :  { %3144 = shalt.err (!%p3141_p4)
}
 0x3df   :  { %s3145_s23 = scalar_lea.hbm %s4467_s6, 512 }
 0x3e0   :  { %p3146_p5 = scmp.ne.s32.totalorder %s4467_s6, %s3145_s23  ;;  %p3149_p6 = scmp.lt.u32.totalorder %s3145_s23, %s4467_s6 }
 0x3e2   :  { %p3151_p7 = pnand %p3149_p6, %p3146_p5 }
 0x3e4   :  { %3154 = shalt.err (!%p3151_p7)
}
 0x3e5   :  { %s3159_s0 = smov 128   ;;  %s3160_s28 = smov 8  }
 0x3e6   :  { %2528 = dma.vmem_to_hbm [thread:$0]  %s2523_s19, 512, %s4467_s6, [#allocation3], %s3159_s0, %s3159_s0, %s3160_s28  }
 0x3e7   :  { %3155 = dma.done.wait [#allocation3], 512  }
 0x3e8   :  { %3156 = vsyncadd [#allocation3], 4294966784 }
 0x3e9   :  { %2532 = vsyncpa [#allocation3], 1 }

</bundles_post_ra>
